<compile_context>
chip_gen: v5e
topology: v5e:2x2
jax: 0.10.0
libtpu: 0.0.40
codegen_flags: <defaults>
</compile_context>

<pallas_src>
import functools

import jax
import jax.numpy as jnp
from jax import lax
from jax.experimental import pallas as pl
from jax.experimental.pallas import tpu as pltpu

EPS = 1e-3      # module uses BatchNorm2d(..., eps=0.001)
KW = 7          # conv kernel width
PAD = 3         # conv padding along W


def _bn_relu_conv_bn_relu_kernel(x_ref, g1_ref, b1_ref, g2_ref, b2_ref, w_ref,
                                 o_ref, *, width):
    """Single grid point; everything lives in VMEM.

    x_ref : (R, C) f32   activations, R = N*H*W flattened with W minor
    g*/b* : (1, C) f32   BN affine parameters
    w_ref : (KW, C_in, C_out) bf16, w_ref[k, ci, co] == torch_w[co, ci, 0, k]
    o_ref : (R, C) f32   output
    """
    R, C = x_ref.shape
    inv_n = 1.0 / R

    # ---- BatchNorm1 (one-pass batch stats, folded affine) + ReLU ------------
    x = x_ref[...]
    s1 = jnp.sum(x, axis=0, keepdims=True)                    # (1, C)
    ss1 = jnp.sum(x * x, axis=0, keepdims=True)                # (1, C)
    mean1 = s1 * inv_n
    var1 = ss1 * inv_n - mean1 * mean1
    a1 = g1_ref[...] * lax.rsqrt(var1 + EPS)                   # gamma * inv_std
    c1 = b1_ref[...] - mean1 * a1
    y = jnp.maximum(x * a1 + c1, 0.0).astype(jnp.bfloat16)     # bf16 MXU operand

    # ---- Conv2d (1,7): 7 full-slab matmuls, sublane-roll shift-accumulate ---
    # w position of each flat row (r mod width), exact in f32 (values < 2^24).
    r_idx = lax.broadcasted_iota(jnp.int32, (R, 1), 0).astype(jnp.float32)
    w_idx = r_idx - jnp.floor(r_idx * (1.0 / width)) * width   # (R, 1)

    # center tap (shift 0, no mask needed)
    acc = jnp.dot(y, w_ref[PAD], preferred_element_type=jnp.float32)
    for j in range(KW):
        if j == PAD:
            continue
        mm = jnp.dot(y, w_ref[j], preferred_element_type=jnp.float32)  # (R, C)
        s = PAD - j                                            # row shift
        shifted = pltpu.roll(mm, shift=s % R, axis=0)          # XLU sublane roll
        if s > 0:
            mask = w_idx >= float(s)                           # valid: w >= PAD-j
        else:
            mask = w_idx <= float(width - 1 + s)               # valid: w <= W-1+PAD-j
        acc = acc + jnp.where(mask, shifted, 0.0)

    # ---- BatchNorm2 (one-pass, folded affine) + ReLU ------------------------
    s2 = jnp.sum(acc, axis=0, keepdims=True)
    ss2 = jnp.sum(acc * acc, axis=0, keepdims=True)
    mean2 = s2 * inv_n
    var2 = ss2 * inv_n - mean2 * mean2
    a2 = g2_ref[...] * lax.rsqrt(var2 + EPS)
    c2 = b2_ref[...] - mean2 * a2
    o_ref[...] = jnp.maximum(acc * a2 + c2, 0.0).astype(o_ref.dtype)


@jax.jit
def bn_relu_conv_bn_relu(x_nchw, gamma1, beta1, gamma2, beta2, w_torch):
    """x_nchw: (N, C, H, W) f32; w_torch: (C_out, C_in, 1, KW) f32."""
    N, C, H, W = x_nchw.shape
    R = N * H * W

    # NCHW -> (R, C): one fused XLA transpose+reshape (no in-kernel reshape).
    x_rc = jnp.transpose(x_nchw, (0, 2, 3, 1)).reshape(R, C)
    # torch weight (co, ci, 1, kw) -> (kw, ci, co), bf16 for the MXU (one fused op).
    w_k = jnp.transpose(w_torch[:, :, 0, :], (2, 1, 0)).astype(jnp.bfloat16)

    vspec = pl.BlockSpec(memory_space=pltpu.MemorySpace.VMEM)
    kern = functools.partial(_bn_relu_conv_bn_relu_kernel, width=W)
    out_rc = pl.pallas_call(
        kern,
        out_shape=jax.ShapeDtypeStruct((R, C), x_nchw.dtype),
        in_specs=[vspec] * 6,
        out_specs=vspec,
    )(x_rc,
      gamma1.reshape(1, C), beta1.reshape(1, C),
      gamma2.reshape(1, C), beta2.reshape(1, C),
      w_k)

    # (R, C) -> NCHW: one fused XLA reshape+transpose.
    return jnp.transpose(out_rc.reshape(N, H, W, C), (0, 3, 1, 2))


def _reference(x_nchw, gamma1, beta1, gamma2, beta2, w_torch):
    """Pure-JAX f32 reference (same training-mode BN semantics)."""
    def bn(x, g, b):
        m = jnp.mean(x, axis=(0, 2, 3), keepdims=True)
        v = jnp.mean((x - m) ** 2, axis=(0, 2, 3), keepdims=True)
        return (x - m) * jax.lax.rsqrt(v + EPS) * g.reshape(1, -1, 1, 1) \
               + b.reshape(1, -1, 1, 1)

    y = jnp.maximum(bn(x_nchw, gamma1, beta1), 0.0)
    yp = jnp.pad(y, ((0, 0), (0, 0), (0, 0), (PAD, PAD)))
    N, C, H, W = x_nchw.shape
    out = jnp.zeros((N, C, H, W), jnp.float32)
    for kw in range(KW):
        # out[n,co,h,w] += sum_ci w[co,ci,0,kw] * yp[n,ci,h,w+kw]
        out = out + jnp.einsum('oc,nchw->nohw', w_torch[:, :, 0, kw],
                               yp[:, :, :, kw:kw + W])
    return jnp.maximum(bn(out, gamma2, beta2), 0.0)


if __name__ == "__main__":
    key = jax.random.PRNGKey(0)
    k_x, k_w, k_g1, k_b1, k_g2, k_b2 = jax.random.split(key, 6)

    # Shapes implied by the module: x = (1, 128, 12, 12)
    N, C, H, W = 1, 128, 12, 12
    x = jax.random.normal(k_x, (N, C, H, W), dtype=jnp.float32)

    # Deterministic synthetic parameters (shapes from module __init__).
    w_conv = jax.random.normal(k_w, (C, C, 1, KW), dtype=jnp.float32) * 0.05
    gamma1 = 1.0 + 0.1 * jax.random.normal(k_g1, (C,), dtype=jnp.float32)
    beta1 = 0.1 * jax.random.normal(k_b1, (C,), dtype=jnp.float32)
    gamma2 = 1.0 + 0.1 * jax.random.normal(k_g2, (C,), dtype=jnp.float32)
    beta2 = 0.1 * jax.random.normal(k_b2, (C,), dtype=jnp.float32)

    out = bn_relu_conv_bn_relu(x, gamma1, beta1, gamma2, beta2, w_conv)
    out = jax.block_until_ready(out)

    ref = _reference(x, gamma1, beta1, gamma2, beta2, w_conv)
    assert out.shape == (N, C, H, W), out.shape
    # Tolerance accounts for bf16 MXU operands (f32 accumulation); observed
    # error is well below this bound against the pure-f32 reference.
    err = float(jnp.max(jnp.abs(out - ref)))
    assert jnp.allclose(out, ref, atol=2e-2, rtol=2e-2), err

    print("KERNEL_OK")
</pallas_src>

<mosaic_0001>
module attributes {stable_mosaic.version = 11 : i64} {
  func.func @_bn_relu_conv_bn_relu_kernel(%arg0: memref<144x128xf32, #tpu.memory_space<vmem>>, %arg1: memref<1x128xf32, #tpu.memory_space<vmem>>, %arg2: memref<1x128xf32, #tpu.memory_space<vmem>>, %arg3: memref<1x128xf32, #tpu.memory_space<vmem>>, %arg4: memref<1x128xf32, #tpu.memory_space<vmem>>, %arg5: memref<7x128x128xbf16, #tpu.memory_space<vmem>>, %arg6: memref<144x128xf32, #tpu.memory_space<vmem>>) attributes {dimension_semantics = [], scalar_prefetch = 0 : i64, scratch_operands = 0 : i64, tpu.core_type = #tpu.core_type<tc>} {
    %c0 = arith.constant 0 : index
    %c0_0 = arith.constant 0 : index
    %0 = vector.load %arg0[%c0, %c0_0] : memref<144x128xf32, #tpu.memory_space<vmem>>, vector<144x128xf32>
    %cst = arith.constant dense<0.000000e+00> : vector<128xf32>
    %1 = vector.multi_reduction <add>, %0, %cst [0] : vector<144x128xf32> to vector<128xf32>
    %2 = vector.shape_cast %1 : vector<128xf32> to vector<1x128xf32>
    %3 = arith.mulf %0, %0 : vector<144x128xf32>
    %cst_1 = arith.constant dense<0.000000e+00> : vector<128xf32>
    %4 = vector.multi_reduction <add>, %3, %cst_1 [0] : vector<144x128xf32> to vector<128xf32>
    %5 = vector.shape_cast %4 : vector<128xf32> to vector<1x128xf32>
    %cst_2 = arith.constant 0.0069444445 : f32
    %6 = vector.broadcast %cst_2 : f32 to vector<1x128xf32>
    %7 = arith.mulf %2, %6 : vector<1x128xf32>
    %cst_3 = arith.constant 0.0069444445 : f32
    %8 = vector.broadcast %cst_3 : f32 to vector<1x128xf32>
    %9 = arith.mulf %5, %8 : vector<1x128xf32>
    %10 = arith.mulf %7, %7 : vector<1x128xf32>
    %11 = arith.subf %9, %10 : vector<1x128xf32>
    %c0_4 = arith.constant 0 : index
    %c0_5 = arith.constant 0 : index
    %12 = vector.load %arg1[%c0_4, %c0_5] : memref<1x128xf32, #tpu.memory_space<vmem>>, vector<1x128xf32>
    %cst_6 = arith.constant 1.000000e-03 : f32
    %13 = vector.broadcast %cst_6 : f32 to vector<1x128xf32>
    %14 = arith.addf %11, %13 : vector<1x128xf32>
    %15 = math.rsqrt %14 : vector<1x128xf32>
    %16 = arith.mulf %12, %15 : vector<1x128xf32>
    %c0_7 = arith.constant 0 : index
    %c0_8 = arith.constant 0 : index
    %17 = vector.load %arg2[%c0_7, %c0_8] : memref<1x128xf32, #tpu.memory_space<vmem>>, vector<1x128xf32>
    %18 = arith.mulf %7, %16 : vector<1x128xf32>
    %19 = arith.subf %17, %18 : vector<1x128xf32>
    %20 = vector.broadcast %16 : vector<1x128xf32> to vector<144x128xf32>
    %21 = arith.mulf %0, %20 : vector<144x128xf32>
    %22 = vector.broadcast %19 : vector<1x128xf32> to vector<144x128xf32>
    %23 = arith.addf %21, %22 : vector<144x128xf32>
    %cst_9 = arith.constant 0.000000e+00 : f32
    %24 = vector.broadcast %cst_9 : f32 to vector<144x128xf32>
    %25 = arith.maximumf %23, %24 : vector<144x128xf32>
    %26 = arith.truncf %25 : vector<144x128xf32> to vector<144x128xbf16>
    %27 = tpu.iota {dimensions = array<i32: 0>} : vector<144x1xi32>
    %28 = arith.sitofp %27 : vector<144x1xi32> to vector<144x1xf32>
    %cst_10 = arith.constant 0.0833333358 : f32
    %29 = vector.broadcast %cst_10 : f32 to vector<144x1xf32>
    %30 = arith.mulf %28, %29 : vector<144x1xf32>
    %31 = math.floor %30 : vector<144x1xf32>
    %cst_11 = arith.constant 1.200000e+01 : f32
    %32 = vector.broadcast %cst_11 : f32 to vector<144x1xf32>
    %33 = arith.mulf %31, %32 : vector<144x1xf32>
    %34 = arith.subf %28, %33 : vector<144x1xf32>
    %c3 = arith.constant 3 : index
    %c0_12 = arith.constant 0 : index
    %c0_13 = arith.constant 0 : index
    %35 = vector.load %arg5[%c3, %c0_12, %c0_13] : memref<7x128x128xbf16, #tpu.memory_space<vmem>>, vector<1x128x128xbf16>
    %36 = vector.shape_cast %35 : vector<1x128x128xbf16> to vector<128x128xbf16>
    %cst_14 = arith.constant dense<0.000000e+00> : vector<144x128xf32>
    %37 = tpu.matmul %26, %36, %cst_14 {dimension_numbers = #tpu.dot_dimension_numbers<[1], [0], [0], [1], [0, 0, 1, 1], [], []>} : vector<144x128xbf16>, vector<128x128xbf16>, vector<144x128xf32> -> vector<144x128xf32>
    %c0_15 = arith.constant 0 : index
    %c0_16 = arith.constant 0 : index
    %c0_17 = arith.constant 0 : index
    %38 = vector.load %arg5[%c0_15, %c0_16, %c0_17] : memref<7x128x128xbf16, #tpu.memory_space<vmem>>, vector<1x128x128xbf16>
    %39 = vector.shape_cast %38 : vector<1x128x128xbf16> to vector<128x128xbf16>
    %cst_18 = arith.constant dense<0.000000e+00> : vector<144x128xf32>
    %40 = tpu.matmul %26, %39, %cst_18 {dimension_numbers = #tpu.dot_dimension_numbers<[1], [0], [0], [1], [0, 0, 1, 1], [], []>} : vector<144x128xbf16>, vector<128x128xbf16>, vector<144x128xf32> -> vector<144x128xf32>
    %c3_i32 = arith.constant 3 : i32
    %41 = tpu.dynamic_rotate %40 by %c3_i32 dim 0 : vector<144x128xf32>, i32 -> vector<144x128xf32>
    %cst_19 = arith.constant 3.000000e+00 : f32
    %42 = vector.broadcast %cst_19 : f32 to vector<144x1xf32>
    %43 = arith.cmpf oge, %34, %42 : vector<144x1xf32>
    %cst_20 = arith.constant 0.000000e+00 : f32
    %44 = vector.shape_cast %43 : vector<144x1xi1> to vector<144x1xi1>
    %45 = vector.broadcast %44 : vector<144x1xi1> to vector<144x128xi1>
    %46 = vector.broadcast %cst_20 : f32 to vector<144x128xf32>
    %47 = arith.select %45, %41, %46 : vector<144x128xi1>, vector<144x128xf32>
    %48 = arith.addf %37, %47 : vector<144x128xf32>
    %c1 = arith.constant 1 : index
    %c0_21 = arith.constant 0 : index
    %c0_22 = arith.constant 0 : index
    %49 = vector.load %arg5[%c1, %c0_21, %c0_22] : memref<7x128x128xbf16, #tpu.memory_space<vmem>>, vector<1x128x128xbf16>
    %50 = vector.shape_cast %49 : vector<1x128x128xbf16> to vector<128x128xbf16>
    %cst_23 = arith.constant dense<0.000000e+00> : vector<144x128xf32>
    %51 = tpu.matmul %26, %50, %cst_23 {dimension_numbers = #tpu.dot_dimension_numbers<[1], [0], [0], [1], [0, 0, 1, 1], [], []>} : vector<144x128xbf16>, vector<128x128xbf16>, vector<144x128xf32> -> vector<144x128xf32>
    %c2_i32 = arith.constant 2 : i32
    %52 = tpu.dynamic_rotate %51 by %c2_i32 dim 0 : vector<144x128xf32>, i32 -> vector<144x128xf32>
    %cst_24 = arith.constant 2.000000e+00 : f32
    %53 = vector.broadcast %cst_24 : f32 to vector<144x1xf32>
    %54 = arith.cmpf oge, %34, %53 : vector<144x1xf32>
    %cst_25 = arith.constant 0.000000e+00 : f32
    %55 = vector.shape_cast %54 : vector<144x1xi1> to vector<144x1xi1>
    %56 = vector.broadcast %55 : vector<144x1xi1> to vector<144x128xi1>
    %57 = vector.broadcast %cst_25 : f32 to vector<144x128xf32>
    %58 = arith.select %56, %52, %57 : vector<144x128xi1>, vector<144x128xf32>
    %59 = arith.addf %48, %58 : vector<144x128xf32>
    %c2 = arith.constant 2 : index
    %c0_26 = arith.constant 0 : index
    %c0_27 = arith.constant 0 : index
    %60 = vector.load %arg5[%c2, %c0_26, %c0_27] : memref<7x128x128xbf16, #tpu.memory_space<vmem>>, vector<1x128x128xbf16>
    %61 = vector.shape_cast %60 : vector<1x128x128xbf16> to vector<128x128xbf16>
    %cst_28 = arith.constant dense<0.000000e+00> : vector<144x128xf32>
    %62 = tpu.matmul %26, %61, %cst_28 {dimension_numbers = #tpu.dot_dimension_numbers<[1], [0], [0], [1], [0, 0, 1, 1], [], []>} : vector<144x128xbf16>, vector<128x128xbf16>, vector<144x128xf32> -> vector<144x128xf32>
    %c1_i32 = arith.constant 1 : i32
    %63 = tpu.dynamic_rotate %62 by %c1_i32 dim 0 : vector<144x128xf32>, i32 -> vector<144x128xf32>
    %cst_29 = arith.constant 1.000000e+00 : f32
    %64 = vector.broadcast %cst_29 : f32 to vector<144x1xf32>
    %65 = arith.cmpf oge, %34, %64 : vector<144x1xf32>
    %cst_30 = arith.constant 0.000000e+00 : f32
    %66 = vector.shape_cast %65 : vector<144x1xi1> to vector<144x1xi1>
    %67 = vector.broadcast %66 : vector<144x1xi1> to vector<144x128xi1>
    %68 = vector.broadcast %cst_30 : f32 to vector<144x128xf32>
    %69 = arith.select %67, %63, %68 : vector<144x128xi1>, vector<144x128xf32>
    %70 = arith.addf %59, %69 : vector<144x128xf32>
    %c4 = arith.constant 4 : index
    %c0_31 = arith.constant 0 : index
    %c0_32 = arith.constant 0 : index
    %71 = vector.load %arg5[%c4, %c0_31, %c0_32] : memref<7x128x128xbf16, #tpu.memory_space<vmem>>, vector<1x128x128xbf16>
    %72 = vector.shape_cast %71 : vector<1x128x128xbf16> to vector<128x128xbf16>
    %cst_33 = arith.constant dense<0.000000e+00> : vector<144x128xf32>
    %73 = tpu.matmul %26, %72, %cst_33 {dimension_numbers = #tpu.dot_dimension_numbers<[1], [0], [0], [1], [0, 0, 1, 1], [], []>} : vector<144x128xbf16>, vector<128x128xbf16>, vector<144x128xf32> -> vector<144x128xf32>
    %c143_i32 = arith.constant 143 : i32
    %74 = tpu.dynamic_rotate %73 by %c143_i32 dim 0 : vector<144x128xf32>, i32 -> vector<144x128xf32>
    %cst_34 = arith.constant 1.000000e+01 : f32
    %75 = vector.broadcast %cst_34 : f32 to vector<144x1xf32>
    %76 = arith.cmpf ole, %34, %75 : vector<144x1xf32>
    %cst_35 = arith.constant 0.000000e+00 : f32
    %77 = vector.shape_cast %76 : vector<144x1xi1> to vector<144x1xi1>
    %78 = vector.broadcast %77 : vector<144x1xi1> to vector<144x128xi1>
    %79 = vector.broadcast %cst_35 : f32 to vector<144x128xf32>
    %80 = arith.select %78, %74, %79 : vector<144x128xi1>, vector<144x128xf32>
    %81 = arith.addf %70, %80 : vector<144x128xf32>
    %c5 = arith.constant 5 : index
    %c0_36 = arith.constant 0 : index
    %c0_37 = arith.constant 0 : index
    %82 = vector.load %arg5[%c5, %c0_36, %c0_37] : memref<7x128x128xbf16, #tpu.memory_space<vmem>>, vector<1x128x128xbf16>
    %83 = vector.shape_cast %82 : vector<1x128x128xbf16> to vector<128x128xbf16>
    %cst_38 = arith.constant dense<0.000000e+00> : vector<144x128xf32>
    %84 = tpu.matmul %26, %83, %cst_38 {dimension_numbers = #tpu.dot_dimension_numbers<[1], [0], [0], [1], [0, 0, 1, 1], [], []>} : vector<144x128xbf16>, vector<128x128xbf16>, vector<144x128xf32> -> vector<144x128xf32>
    %c142_i32 = arith.constant 142 : i32
    %85 = tpu.dynamic_rotate %84 by %c142_i32 dim 0 : vector<144x128xf32>, i32 -> vector<144x128xf32>
    %cst_39 = arith.constant 9.000000e+00 : f32
    %86 = vector.broadcast %cst_39 : f32 to vector<144x1xf32>
    %87 = arith.cmpf ole, %34, %86 : vector<144x1xf32>
    %cst_40 = arith.constant 0.000000e+00 : f32
    %88 = vector.shape_cast %87 : vector<144x1xi1> to vector<144x1xi1>
    %89 = vector.broadcast %88 : vector<144x1xi1> to vector<144x128xi1>
    %90 = vector.broadcast %cst_40 : f32 to vector<144x128xf32>
    %91 = arith.select %89, %85, %90 : vector<144x128xi1>, vector<144x128xf32>
    %92 = arith.addf %81, %91 : vector<144x128xf32>
    %c6 = arith.constant 6 : index
    %c0_41 = arith.constant 0 : index
    %c0_42 = arith.constant 0 : index
    %93 = vector.load %arg5[%c6, %c0_41, %c0_42] : memref<7x128x128xbf16, #tpu.memory_space<vmem>>, vector<1x128x128xbf16>
    %94 = vector.shape_cast %93 : vector<1x128x128xbf16> to vector<128x128xbf16>
    %cst_43 = arith.constant dense<0.000000e+00> : vector<144x128xf32>
    %95 = tpu.matmul %26, %94, %cst_43 {dimension_numbers = #tpu.dot_dimension_numbers<[1], [0], [0], [1], [0, 0, 1, 1], [], []>} : vector<144x128xbf16>, vector<128x128xbf16>, vector<144x128xf32> -> vector<144x128xf32>
    %c141_i32 = arith.constant 141 : i32
    %96 = tpu.dynamic_rotate %95 by %c141_i32 dim 0 : vector<144x128xf32>, i32 -> vector<144x128xf32>
    %cst_44 = arith.constant 8.000000e+00 : f32
    %97 = vector.broadcast %cst_44 : f32 to vector<144x1xf32>
    %98 = arith.cmpf ole, %34, %97 : vector<144x1xf32>
    %cst_45 = arith.constant 0.000000e+00 : f32
    %99 = vector.shape_cast %98 : vector<144x1xi1> to vector<144x1xi1>
    %100 = vector.broadcast %99 : vector<144x1xi1> to vector<144x128xi1>
    %101 = vector.broadcast %cst_45 : f32 to vector<144x128xf32>
    %102 = arith.select %100, %96, %101 : vector<144x128xi1>, vector<144x128xf32>
    %103 = arith.addf %92, %102 : vector<144x128xf32>
    %cst_46 = arith.constant dense<0.000000e+00> : vector<128xf32>
    %104 = vector.multi_reduction <add>, %103, %cst_46 [0] : vector<144x128xf32> to vector<128xf32>
    %105 = vector.shape_cast %104 : vector<128xf32> to vector<1x128xf32>
    %106 = arith.mulf %103, %103 : vector<144x128xf32>
    %cst_47 = arith.constant dense<0.000000e+00> : vector<128xf32>
    %107 = vector.multi_reduction <add>, %106, %cst_47 [0] : vector<144x128xf32> to vector<128xf32>
    %108 = vector.shape_cast %107 : vector<128xf32> to vector<1x128xf32>
    %cst_48 = arith.constant 0.0069444445 : f32
    %109 = vector.broadcast %cst_48 : f32 to vector<1x128xf32>
    %110 = arith.mulf %105, %109 : vector<1x128xf32>
    %cst_49 = arith.constant 0.0069444445 : f32
    %111 = vector.broadcast %cst_49 : f32 to vector<1x128xf32>
    %112 = arith.mulf %108, %111 : vector<1x128xf32>
    %113 = arith.mulf %110, %110 : vector<1x128xf32>
    %114 = arith.subf %112, %113 : vector<1x128xf32>
    %c0_50 = arith.constant 0 : index
    %c0_51 = arith.constant 0 : index
    %115 = vector.load %arg3[%c0_50, %c0_51] : memref<1x128xf32, #tpu.memory_space<vmem>>, vector<1x128xf32>
    %cst_52 = arith.constant 1.000000e-03 : f32
    %116 = vector.broadcast %cst_52 : f32 to vector<1x128xf32>
    %117 = arith.addf %114, %116 : vector<1x128xf32>
    %118 = math.rsqrt %117 : vector<1x128xf32>
    %119 = arith.mulf %115, %118 : vector<1x128xf32>
    %c0_53 = arith.constant 0 : index
    %c0_54 = arith.constant 0 : index
    %120 = vector.load %arg4[%c0_53, %c0_54] : memref<1x128xf32, #tpu.memory_space<vmem>>, vector<1x128xf32>
    %121 = arith.mulf %110, %119 : vector<1x128xf32>
    %122 = arith.subf %120, %121 : vector<1x128xf32>
    %123 = vector.broadcast %119 : vector<1x128xf32> to vector<144x128xf32>
    %124 = arith.mulf %103, %123 : vector<144x128xf32>
    %125 = vector.broadcast %122 : vector<1x128xf32> to vector<144x128xf32>
    %126 = arith.addf %124, %125 : vector<144x128xf32>
    %cst_55 = arith.constant 0.000000e+00 : f32
    %127 = vector.broadcast %cst_55 : f32 to vector<144x128xf32>
    %128 = arith.maximumf %126, %127 : vector<144x128xf32>
    %c0_56 = arith.constant 0 : index
    %c0_57 = arith.constant 0 : index
    %129 = vector.load %arg6[%c0_56, %c0_57] : memref<144x128xf32, #tpu.memory_space<vmem>>, vector<144x128xf32>
    tpu.vector_store %arg6[%c0_56, %c0_57], %128 {strides = array<i32>} : memref<144x128xf32, #tpu.memory_space<vmem>>, vector<144x128xf32>,
    return
  }
}

</mosaic_0001>

<bundles_post_ra>
// kernel: bn_relu_conv_bn_relu.1
= control target key start
LH: loop header
LB: loop body
LE: loop exit
PB: predicated region body
PF: predicated region fallthrough
CT: control target
= control target key end

     0   :  { %s4023_s5 = inlined_call_operand.vmem [shape: bf16[7,128,128], index: 5, kind: input, shape index: {}]   ;;  %s4024_s0 = inlined_call_operand.vmem [shape: f32[144,128], index: 0, kind: input, shape index: {}]   ;;  %s4025_s1 = inlined_call_operand.vmem [shape: f32[1,128], index: 1, kind: input, shape index: {}]   ;;  %s4026_s2 = inlined_call_operand.vmem [shape: f32[1,128], index: 2, kind: input, shape index: {}]   ;;  %s4027_s3 = inlined_call_operand.vmem [shape: f32[1,128], index: 3, kind: input, shape index: {}]   ;;  %s4028_s4 = inlined_call_operand.vmem [shape: f32[1,128], index: 4, kind: input, shape index: {}]   ;;  %s4029_s6 = inlined_call_operand.vmem [shape: f32[144,128], index: 6, kind: output, shape index: {}]  }
   0x1   :  { %v2380_v0 = vld [vmem:[%s4023_s5 + $0x38] sm:$0xff]  ;;  %v2379_v3 = vld [vmem:[%s4023_s5 + $0x30] sm:$0xff]  ;;  %v2378_v6 = vld [vmem:[%s4023_s5 + $0x28] sm:$0xff] }
   0x2   :  { %v2490_v1 = vld [vmem:[%s4023_s5 + $0xf8] sm:$0xff]  ;;  %384 = vmatpush.bf16.msra.mxu0 %v2380_v0  ;;  %2421 = vmatpush.bf16.msra.mxu3 %v2380_v0  ;;  %v2505_v4 = vld [vmem:[%s4023_s5 + $0xf0] sm:$0xff]  ;;  %v2520_v7 = vld [vmem:[%s4023_s5 + $0xe8] sm:$0xff] }
   0x3   :  { %v2495_v2 = vld [vmem:[%s4023_s5 + $0x78] sm:$0xff]  ;;  %2429 = vmatpush.bf16.msra.mxu1 %v2490_v1  ;;  %v2510_v5 = vld [vmem:[%s4023_s5 + $0x70] sm:$0xff]  ;;  %v2525_v8 = vld [vmem:[%s4023_s5 + $0x68] sm:$0xff] }
   0x4   :  { %2437 = vmatpush.bf16.msra.mxu2 %v2495_v2  ;;  %v2530_v9 = vld [vmem:[%s4024_s0] sm:$0xff]  ;;  %v2535_v10 = vld [vmem:[%s4024_s0 + $0x8] sm:$0xff]  ;;  %v2540_v11 = vld [vmem:[%s4024_s0 + $0x10] sm:$0xff] }
   0x5   :  { %v41_v12 = vadd.f32 %v2535_v10, %v2530_v9  ;;  %v2377_v13 = vld [vmem:[%s4023_s5 + $0x20] sm:$0xff]  ;;  %v2550_v14 = vld [vmem:[%s4024_s0 + $0x18] sm:$0xff]  ;;  %v64_v18 = vmul.f32 %v2530_v9, %v2530_v9  ;;  %v65_v19 = vmul.f32 %v2535_v10, %v2535_v10  ;;  %v66_v22 = vmul.f32 %v2540_v11, %v2540_v11  ;;  %v2583_v24 = vld [vmem:[%s4024_s0 + $0x28] sm:$0xff] }
   0x6   :  { %385 = vmatpush.bf16.msra.mxu0 %v2379_v3  ;;  %2422 = vmatpush.bf16.msra.mxu3 %v2379_v3  ;;  %v2557_v15 = vld [vmem:[%s4023_s5 + $0xe0] sm:$0xff]  ;;  %v2376_v23 = vld [vmem:[%s4023_s5 + $0x18] sm:$0xff]  ;;  %v67_v28 = vmul.f32 %v2550_v14, %v2550_v14  ;;  %v2603_v30 = vld [vmem:[%s4024_s0 + $0x30] sm:$0xff]  ;;  %v69_v39 = vmul.f32 %v2583_v24, %v2583_v24 }
   0x7   :  { %2430 = vmatpush.bf16.msra.mxu1 %v2505_v4  ;;  %v2562_v16 = vld [vmem:[%s4023_s5 + $0x60] sm:$0xff]  ;;  %v42_v17 = vadd.f32 %v41_v12, %v2540_v11  ;;  %v2590_v25 = vld [vmem:[%s4023_s5 + $0xd8] sm:$0xff]  ;;  %v82_v29 = vadd.f32 %v65_v19, %v64_v18  ;;  %v2375_v34 = vld [vmem:[%s4023_s5 + $0x10] sm:$0xff]  ;;  %v70_v43 = vmul.f32 %v2603_v30, %v2603_v30 }
   0x8   :  { %2438 = vmatpush.bf16.msra.mxu2 %v2510_v5  ;;  %v2572_v20 = vld [vmem:[%s4024_s0 + $0x20] sm:$0xff]  ;;  %v2595_v26 = vld [vmem:[%s4023_s5 + $0x58] sm:$0xff]  ;;  %v2621_v36 = vld [vmem:[%s4023_s5 + $0xd0] sm:$0xff] }
   0x9   :  { %v43_v21 = vadd.f32 %v42_v17, %v2550_v14  ;;  %v68_v32 = vmul.f32 %v2572_v20, %v2572_v20  ;;  %v83_v33 = vadd.f32 %v82_v29, %v66_v22  ;;  %v2614_v35 = vld [vmem:[%s4024_s0 + $0x38] sm:$0xff]  ;;  %v2626_v37 = vld [vmem:[%s4023_s5 + $0x50] sm:$0xff]  ;;  %v2634_v41 = vld [vmem:[%s4024_s0 + $0x40] sm:$0xff] }
   0xa   :  { %386 = vmatpush.bf16.msra.mxu0 %v2378_v6  ;;  %2423 = vmatpush.bf16.msra.mxu3 %v2378_v6  ;;  %v2374_v45 = vld [vmem:[%s4023_s5 + $0x8] sm:$0xff]  ;;  %v71_v50 = vmul.f32 %v2614_v35, %v2614_v35  ;;  %v2665_v52 = vld [vmem:[%s4024_s0 + $0x50] sm:$0xff]  ;;  %v72_v54 = vmul.f32 %v2634_v41, %v2634_v41  ;;  %v2373_v56 = vld [vmem:[%s4023_s5] sm:$0xff] }
   0xb   :  { %2431 = vmatpush.bf16.msra.mxu1 %v2520_v7  ;;  %v44_v27 = vadd.f32 %v43_v21, %v2572_v20  ;;  %v84_v40 = vadd.f32 %v83_v33, %v67_v28  ;;  %v2645_v46 = vld [vmem:[%s4024_s0 + $0x48] sm:$0xff]  ;;  %v2676_v57 = vld [vmem:[%s4024_s0 + $0x58] sm:$0xff]  ;;  %v2365_v58 = vld [vmem:[%s4023_s5 + $0xc0] sm:$0xff]  ;;  %v74_v3 = vmul.f32 %v2665_v52, %v2665_v52 }
   0xc   :  { %2439 = vmatpush.bf16.msra.mxu2 %v2525_v8  ;;  %v2652_v47 = vld [vmem:[%s4023_s5 + $0xc8] sm:$0xff]  ;;  %v2686_v59 = vld [vmem:[%s4023_s5 + $0x40] sm:$0xff]  ;;  %v73_v61 = vmul.f32 %v2645_v46, %v2645_v46  ;;  %v75_v17 = vmul.f32 %v2676_v57, %v2676_v57  ;;  %v2711_v19 = vld [vmem:[%s4024_s0 + $0x70] sm:$0xff] }
   0xd   :  { %v45_v31 = vadd.f32 %v44_v27, %v2583_v24  ;;  %v85_v44 = vadd.f32 %v84_v40, %v68_v32  ;;  %v2657_v48 = vld [vmem:[%s4023_s5 + $0x48] sm:$0xff]  ;;  %v2694_v63 = vld [vmem:[%s4024_s0 + $0x60] sm:$0xff]  ;;  %v2720_v27 = vld [vmem:[%s4024_s0 + $0x78] sm:$0xff]  ;;  %v78_v33 = vmul.f32 %v2711_v19, %v2711_v19 }
   0xe   :  { %387 = vmatpush.bf16.msra.mxu0 %v2377_v13  ;;  %2424 = vmatpush.bf16.msra.mxu3 %v2377_v13  ;;  %v2702_v12 = vld [vmem:[%s4024_s0 + $0x68] sm:$0xff]  ;;  %v76_v22 = vmul.f32 %v2694_v63, %v2694_v63  ;;  %v79_v40 = vmul.f32 %v2720_v27, %v2720_v27 }
   0xf   :  { %2432 = vmatpush.bf16.msra.mxu1 %v2557_v15  ;;  %v46_v38 = vadd.f32 %v45_v31, %v2603_v30  ;;  %v86_v51 = vadd.f32 %v85_v44, %v69_v39  ;;  %v77_v29 = vmul.f32 %v2702_v12, %v2702_v12 }
  0x10   :  { %2440 = vmatpush.bf16.msra.mxu2 %v2562_v16 }
  0x11   :  { %v47_v42 = vadd.f32 %v46_v38, %v2614_v35  ;;  %v87_v55 = vadd.f32 %v86_v51, %v70_v43  ;;  %v2737_v38 = vld [vmem:[%s4024_s0 + $0x88] sm:$0xff] }
  0x12   :  { %388 = vmatpush.bf16.msra.mxu0 %v2376_v23  ;;  %2425 = vmatpush.bf16.msra.mxu3 %v2376_v23 }
  0x13   :  { %2433 = vmatpush.bf16.msra.mxu1 %v2590_v25  ;;  %v48_v49 = vadd.f32 %v47_v42, %v2634_v41  ;;  %v88_v62 = vadd.f32 %v87_v55, %v71_v50 }
  0x14   :  { %2441 = vmatpush.bf16.msra.mxu2 %v2595_v26 }
  0x15   :  { %v49_v53 = vadd.f32 %v48_v49, %v2645_v46  ;;  %v89_v6 = vadd.f32 %v88_v62, %v72_v54  ;;  %v81_v49 = vmul.f32 %v2737_v38, %v2737_v38 }
  0x16   :  { %389 = vmatpush.bf16.msra.mxu0 %v2375_v34  ;;  %2426 = vmatpush.bf16.msra.mxu3 %v2375_v34 }
  0x17   :  { %2434 = vmatpush.bf16.msra.mxu1 %v2621_v36  ;;  %v50_v60 = vadd.f32 %v49_v53, %v2665_v52  ;;  %v90_v18 = vadd.f32 %v89_v6, %v73_v61 }
  0x18   :  { %2442 = vmatpush.bf16.msra.mxu2 %v2626_v37 }
  0x19   :  { %v51_v0 = vadd.f32 %v50_v60, %v2676_v57  ;;  %v91_v23 = vadd.f32 %v90_v18, %v74_v3 }
  0x1a   :  { %390 = vmatpush.bf16.msra.mxu0 %v2374_v45  ;;  %2427 = vmatpush.bf16.msra.mxu3 %v2374_v45 }
  0x1b   :  { %2435 = vmatpush.bf16.msra.mxu1 %v2652_v47  ;;  %v52_v13 = vadd.f32 %v51_v0, %v2694_v63  ;;  %v92_v31 = vadd.f32 %v91_v23, %v75_v17 }
  0x1c   :  { %2443 = vmatpush.bf16.msra.mxu2 %v2657_v48 }
  0x1d   :  { %v53_v21 = vadd.f32 %v52_v13, %v2702_v12  ;;  %v93_v34 = vadd.f32 %v92_v31, %v76_v22  ;;  %v109_v31 = vld [vmem:[%s4025_s1] sm:$0x1] }
  0x1e   :  { %391 = vmatpush.bf16.msra.mxu0 %v2373_v56  ;;  %2428 = vmatpush.bf16.msra.mxu3 %v2373_v56 }
  0x1f   :  { %2436 = vmatpush.bf16.msra.mxu1 %v2365_v58  ;;  %v54_v28 = vadd.f32 %v53_v21, %v2711_v19  ;;  %v94_v42 = vadd.f32 %v93_v34, %v77_v29  ;;  %v2394_v34 = vld [vmem:[%s4023_s5 + $0xa8] sm:$0xff] }
  0x20   :  { %2444 = vmatpush.bf16.msra.mxu2 %v2686_v59 }
  0x21   :  { %v55_v32 = vadd.f32 %v54_v28, %v2720_v27  ;;  %v95_v44 = vadd.f32 %v94_v42, %v78_v33 }
  0x22   :  { %595 = vmatpush.bf16.msrb.mxu0 %v2490_v1  ;;  %v2728_v1 = vld [vmem:[%s4024_s0 + $0x80] sm:$0xff] }
  0x23   :  { %v56_v39 = vadd.f32 %v55_v32, %v2728_v1  ;;  %v80_v43 = vmul.f32 %v2728_v1, %v2728_v1  ;;  %v96_v50 = vadd.f32 %v95_v44, %v79_v40  ;;  %v122_v40 = vld [vmem:[%s4026_s2] sm:$0x1] }
  0x25   :  { %v97_v53 = vadd.f32 %v96_v50, %v80_v43 }
  0x26   :  { %596 = vmatpush.bf16.msrb.mxu0 %v2505_v4  ;;  %v57_v4 = vadd.f32 %v56_v39, %v2737_v38 }
  0x27   :  { %v98_v55 = vadd.f32 %v97_v53, %v81_v49 }
  0x28   :  { %v58_v45 = vrot.slane %v57_v4, 4 }
  0x29   :  { %v99_v56 = vrot.slane %v98_v55, 4 }
  0x2a   :  { %597 = vmatpush.bf16.msrb.mxu0 %v2520_v7  ;;  %v59_v51 = vadd.f32 %v58_v45, %v57_v4 }
  0x2b   :  { %v100_v61 = vadd.f32 %v99_v56, %v98_v55 }
  0x2c   :  { %v60_v54 = vrot.slane %v59_v51, 2 }
  0x2d   :  { %v101_v0 = vrot.slane %v100_v61, 2 }
  0x2e   :  { %598 = vmatpush.bf16.msrb.mxu0 %v2557_v15  ;;  %v61_v7 = vadd.f32 %v60_v54, %v59_v51 }
  0x2f   :  { %v102_v3 = vadd.f32 %v101_v0, %v100_v61 }
  0x30   :  { %v62_v60 = vrot.slane %v61_v7, 1 }
  0x31   :  { %v103_v13 = vrot.slane %v102_v3, 1 }
  0x32   :  { %599 = vmatpush.bf16.msrb.mxu0 %v2590_v25  ;;  %v63_v62 = vadd.f32 %v62_v60, %v61_v7  ;;  %v2396_v25 = vld [vmem:[%s4023_s5 + $0xb8] sm:$0xff] }
  0x33   :  { %v104_v15 = vadd.f32 %v103_v13, %v102_v3  ;;  %960 = vmatpush.bf16.msrb.mxu3 %v2396_v25 }
  0x34   :  { %v105_v6 = vmul.f32 0.0069444445, %v63_v62 }
  0x35   :  { %v106_v18 = vmul.f32 0.0069444445, %v104_v15 }
  0x36   :  { %600 = vmatpush.bf16.msrb.mxu0 %v2621_v36  ;;  %v107_v17 = vmul.f32 %v105_v6, %v105_v6  ;;  %v2395_v36 = vld [vmem:[%s4023_s5 + $0xb0] sm:$0xff] }
  0x37   :  { %961 = vmatpush.bf16.msrb.mxu3 %v2395_v36 }
  0x38   :  { %v108_v21 = vsub.f32 %v106_v18, %v107_v17 }
  0x3a   :  { %601 = vmatpush.bf16.msrb.mxu0 %v2652_v47  ;;  %v110_v22 = vadd.f32 0.001, %v108_v21 }
  0x3b   :  { %962 = vmatpush.bf16.msrb.mxu3 %v2394_v34 }
  0x3c   :  { %2445 = vrsqrt.f32 %v110_v22  ;;  %vm117_vm0 = vweird.f32 %v110_v22 }
  0x3e   :  { %602 = vmatpush.bf16.msrb.mxu0 %v2365_v58 }
  0x42   :  { %v2446_v23 = vpop.eup %2445 }
  0x43   :  { %v112_v28 = vmul.f32 %v2446_v23, %v110_v22  ;;  %vm118_vm1 = vweird.f32 %v2446_v23 }
  0x44   :  { %vm119_vm2 = vmor %vm117_vm0, %vm118_vm1 }
  0x45   :  { %v113_v47 = vmul.f32 %v2446_v23, %v112_v28 }
  0x47   :  { %v114_v29 = vmul.f32 0.5, %v113_v47 }
  0x49   :  { %v115_v58 = vsub.f32 1.5, %v114_v29 }
  0x4b   :  { %v116_v32 = vmul.f32 %v2446_v23, %v115_v58 }
  0x4d   :  { %v120_v33 = vsel %vm119_vm2, %v2446_v23, %v116_v32  ;;  %v2392_v23 = vld [vmem:[%s4023_s5 + $0x98] sm:$0xff] }
  0x4e   :  { %v121_v39 = vmul.f32 %v120_v33, %v109_v31 }
  0x50   :  { %v123_v42 = vmul.f32 %v121_v39, %v105_v6  ;;  %v2767_v4 = vperm.slane %v121_v39, 0  ;;  %v2412_v6 = vld [vmem:[%s4023_s5 + $0x178] sm:$0xff] }
  0x51   :  { %1452 = vmatpush.bf16.msrb.mxu1 %v2412_v6  ;;  %v2404_v39 = vld [vmem:[%s4023_s5 + $0x138] sm:$0xff] }
  0x52   :  { %v124_v43 = vsub.f32 %v122_v40, %v123_v42  ;;  %v128_v44 = vmul.f32 %v2767_v4, %v2530_v9  ;;  %v129_v45 = vmul.f32 %v2767_v4, %v2535_v10  ;;  %v132_v49 = vmul.f32 %v2767_v4, %v2572_v20  ;;  %v2403_v40 = vld [vmem:[%s4023_s5 + $0x130] sm:$0xff] }
  0x53   :  { %v133_v50 = vmul.f32 %v2767_v4, %v2583_v24  ;;  %v130_v24 = vmul.f32 %v2767_v4, %v2540_v11  ;;  %v131_v62 = vmul.f32 %v2767_v4, %v2550_v14  ;;  %v134_v0 = vmul.f32 %v2767_v4, %v2603_v30  ;;  %v2420_v11 = vld [vmem:[%s4023_s5 + $0x1b8] sm:$0xff]  ;;  %v2393_v14 = vld [vmem:[%s4023_s5 + $0xa0] sm:$0xff]  ;;  %v2391_v42 = vld [vmem:[%s4023_s5 + $0x90] sm:$0xff] }
  0x54   :  { %v2777_v51 = vperm.slane %v124_v43, 0  ;;  %v135_v3 = vmul.f32 %v2767_v4, %v2614_v35  ;;  %1698 = vmatpush.bf16.msrb.mxu2 %v2420_v11  ;;  %963 = vmatpush.bf16.msrb.mxu3 %v2393_v14  ;;  %v136_v36 = vmul.f32 %v2767_v4, %v2634_v41  ;;  %v140_v41 = vmul.f32 %v2767_v4, %v2694_v63  ;;  %v2417_v43 = vld [vmem:[%s4023_s5 + $0x1a0] sm:$0xff]  ;;  %v2416_v11 = vld [vmem:[%s4023_s5 + $0x198] sm:$0xff] }
  0x55   :  { %v138_v34 = vmul.f32 %v2767_v4, %v2665_v52  ;;  %v142_v52 = vmul.f32 %v2767_v4, %v2711_v19 }
  0x56   :  { %v149_v53 = vadd.f32 %v2777_v51, %v128_v44  ;;  %v150_v54 = vadd.f32 %v2777_v51, %v129_v45  ;;  %v153_v55 = vadd.f32 %v2777_v51, %v132_v49  ;;  %v154_v7 = vadd.f32 %v2777_v51, %v133_v50 }
  0x57   :  { %v151_v30 = vadd.f32 %v2777_v51, %v130_v24  ;;  %v152_v35 = vadd.f32 %v2777_v51, %v131_v62  ;;  %v155_v13 = vadd.f32 %v2777_v51, %v134_v0  ;;  %v156_v15 = vadd.f32 %v2777_v51, %v135_v3  ;;  %v2390_v24 = vld [vmem:[%s4023_s5 + $0x88] sm:$0xff]  ;;  %v2399_v3 = vld [vmem:[%s4023_s5 + $0x110] sm:$0xff] }
  0x58   :  { %v167_v9 = vmax.f32 %v149_v53, 0.0  ;;  %v168_v56 = vmax.f32 %v150_v54, 0.0  ;;  %v171_v60 = vmax.f32 %v153_v55, 0.0  ;;  %v172_v10 = vmax.f32 %v154_v7, 0.0  ;;  %964 = vmatpush.bf16.msrb.mxu3 %v2392_v23  ;;  %v2402_v53 = vld [vmem:[%s4023_s5 + $0x128] sm:$0xff] }
  0x59   :  { %v169_v17 = vmax.f32 %v151_v30, 0.0  ;;  %v170_v18 = vmax.f32 %v152_v35, 0.0  ;;  %v173_v21 = vmax.f32 %v155_v13, 0.0  ;;  %v174_v22 = vmax.f32 %v156_v15, 0.0  ;;  %v2397_v35 = vld [vmem:[%s4023_s5 + $0x100] sm:$0xff]  ;;  %v2415_v15 = vld [vmem:[%s4023_s5 + $0x190] sm:$0xff] }
  0x5a   :  { %v2783_v61 = vpack.c.bf16 %v168_v56, %v167_v9  ;;  %v2785_v20 = vpack.c.bf16 %v172_v10, %v171_v60  ;;  %v161_v28 = vadd.f32 %v2777_v51, %v140_v41  ;;  %v157_v29 = vadd.f32 %v2777_v51, %v136_v36  ;;  %v2401_v9 = vld [vmem:[%s4023_s5 + $0x120] sm:$0xff]  ;;  %v2400_v60 = vld [vmem:[%s4023_s5 + $0x118] sm:$0xff] }
  0x5b   :  { %v2817_v25 = vpack.c.bf16 %v174_v22, %v173_v21  ;;  %v163_v19 = vadd.f32 %v2777_v51, %v142_v52  ;;  %v2409_v10 = vld [vmem:[%s4023_s5 + $0x160] sm:$0xff]  ;;  %v144_v62 = vmul.f32 %v2767_v4, %v2728_v1  ;;  %v145_v0 = vmul.f32 %v2767_v4, %v2737_v38  ;;  %v2398_v38 = vld [vmem:[%s4023_s5 + $0x108] sm:$0xff] }
  0x5c   :  { %392 = vmatmul.bf16.vlgmr.msra.gmra.mxu0 %v2783_v61  ;;  %402 = vmatmul.bf16.vlgmr.msra.gmra.mxu3 %v2785_v20  ;;  %v179_v31 = vmax.f32 %v161_v28, 0.0  ;;  %v2389_v13 = vld [vmem:[%s4023_s5 + $0x80] sm:$0xff]  ;;  %v2406_v21 = vld [vmem:[%s4023_s5 + $0x148] sm:$0xff] }
  0x5d   :  { %613 = vmatmul.bf16.vlgmr.msra.gmra.mxu1 %v2785_v20  ;;  %732 = vmatmul.bf16.vlgmr.msra.gmra.mxu2 %v2785_v20  ;;  %v181_v49 = vmax.f32 %v163_v19, 0.0  ;;  %v165_v6 = vadd.f32 %v2777_v51, %v144_v62  ;;  %v166_v14 = vadd.f32 %v2777_v51, %v145_v0  ;;  %v2413_v22 = vld [vmem:[%s4023_s5 + $0x180] sm:$0xff] }
  0x5e   :  { %714 = vmatpush.bf16.msra.mxu0 %v2495_v2  ;;  %v2815_v2 = vpack.c.bf16 %v170_v18, %v169_v17  ;;  %965 = vmatpush.bf16.msrb.mxu3 %v2391_v42  ;;  %v2407_v17 = vld [vmem:[%s4023_s5 + $0x150] sm:$0xff]  ;;  %v2414_v18 = vld [vmem:[%s4023_s5 + $0x188] sm:$0xff]  ;;  %v2405_v36 = vld [vmem:[%s4023_s5 + $0x140] sm:$0xff] }
  0x5f   :  { %v183_v1 = vmax.f32 %v165_v6, 0.0  ;;  %v184_v30 = vmax.f32 %v166_v14, 0.0 }
  0x62   :  { %715 = vmatpush.bf16.msra.mxu0 %v2510_v5  ;;  %v137_v5 = vmul.f32 %v2767_v4, %v2645_v46  ;;  %v141_v46 = vmul.f32 %v2767_v4, %v2702_v12  ;;  %v175_v12 = vmax.f32 %v157_v29, 0.0  ;;  %966 = vmatpush.bf16.msrb.mxu3 %v2390_v24 }
  0x64   :  { %v162_v47 = vadd.f32 %v2777_v51, %v141_v46  ;;  %v158_v58 = vadd.f32 %v2777_v51, %v137_v5  ;;  %v194_v5 = vlaneseq }
  0x66   :  { %716 = vmatpush.bf16.msra.mxu0 %v2525_v8  ;;  %v2419_v8 = vld [vmem:[%s4023_s5 + $0x1b0] sm:$0xff]  ;;  %v180_v32 = vmax.f32 %v162_v47, 0.0  ;;  %v176_v33 = vmax.f32 %v158_v58, 0.0  ;;  %967 = vmatpush.bf16.msrb.mxu3 %v2389_v13 }
  0x67   :  { %1699 = vmatpush.bf16.msrb.mxu2 %v2419_v8  ;;  %v2966_v8 = vshrl.u32 %v194_v5, 7 }
  0x68   :  { %v2847_v63 = vpack.c.bf16 %v180_v32, %v179_v31 }
  0x69   :  { %v201_v46 = vadd.s32 48, %v2966_v8  ;;  %v199_v29 = vadd.s32 32, %v2966_v8  ;;  %vm456_vm3 = vcmp.lt.s32.totalorder %v2966_v8, 3  ;;  %vm786_vm5 = vcmp.lt.s32.totalorder %v2966_v8, 2 }
  0x6a   :  { %717 = vmatpush.bf16.msra.mxu0 %v2562_v16  ;;  %v2411_v16 = vld [vmem:[%s4023_s5 + $0x170] sm:$0xff] }
  0x6b   :  { %1453 = vmatpush.bf16.msrb.mxu1 %v2411_v16  ;;  %v200_v16 = vadd.s32 40, %v2966_v8  ;;  %v219_v31 = vcvt.s32.f32 %v201_v46 }
  0x6c   :  { %397 = vmatmul.bf16.gmra.mxu0 %v2815_v2  ;;  %407 = vmatmul.bf16.gmra.mxu3 %v2817_v25 }
  0x6d   :  { %618 = vmatmul.bf16.gmra.mxu1 %v2817_v25  ;;  %737 = vmatmul.bf16.gmra.mxu2 %v2817_v25  ;;  %v218_v23 = vcvt.s32.f32 %v200_v16 }
  0x6e   :  { %718 = vmatpush.bf16.msra.mxu0 %v2595_v26  ;;  %v2850_v26 = vpack.c.bf16 %v176_v33, %v175_v12  ;;  %v2986_v33 = vadd.s32 56, %v2966_v8 }
  0x6f   :  { %v236_v41 = vmul.f32 0.083333336, %v218_v23 }
  0x71   :  { %v254_v58 = vfloor.f32 %v236_v41 }
  0x72   :  { %719 = vmatpush.bf16.msra.mxu0 %v2626_v37  ;;  %v139_v37 = vmul.f32 %v2767_v4, %v2676_v57  ;;  %v143_v57 = vmul.f32 %v2767_v4, %v2720_v27  ;;  %v159_v27 = vadd.f32 %v2777_v51, %v138_v34  ;;  %v2925_v4 = vpack.c.bf16 %v184_v30, %v183_v1 }
  0x73   :  { %v272_v12 = vmul.f32 12.0, %v254_v58 }
  0x74   :  { %v164_v44 = vadd.f32 %v2777_v51, %v143_v57  ;;  %v160_v45 = vadd.f32 %v2777_v51, %v139_v37  ;;  %v177_v55 = vmax.f32 %v159_v27, 0.0  ;;  %v2408_v51 = vld [vmem:[%s4023_s5 + $0x158] sm:$0xff]  ;;  %v237_v37 = vmul.f32 0.083333336, %v219_v31 }
  0x76   :  { %720 = vmatpush.bf16.msra.mxu0 %v2657_v48  ;;  %v2418_v48 = vld [vmem:[%s4023_s5 + $0x1a8] sm:$0xff]  ;;  %v182_v50 = vmax.f32 %v164_v44, 0.0  ;;  %v178_v7 = vmax.f32 %v160_v45, 0.0  ;;  %v255_v42 = vfloor.f32 %v237_v37  ;;  %v2999_v44 = vadd.s32 8, %v2966_v8 }
  0x77   :  { %1700 = vmatpush.bf16.msrb.mxu2 %v2418_v48 }
  0x78   :  { %v2890_v54 = vpack.c.bf16 %v182_v50, %v181_v49  ;;  %v2895_v56 = vpack.c.bf16 %v178_v7, %v177_v55 }
  0x7a   :  { %721 = vmatpush.bf16.msra.mxu0 %v2686_v59  ;;  %v2410_v59 = vld [vmem:[%s4023_s5 + $0x168] sm:$0xff] }
  0x7b   :  { %1454 = vmatpush.bf16.msrb.mxu1 %v2410_v59  ;;  %1701 = vmatpush.bf16.msrb.mxu2 %v2417_v43  ;;  %v2996_v43 = vadd.s32 64, %v2966_v8 }
  0x7c   :  { %412 = vmatmul.bf16.gmra.mxu3 %v2850_v26  ;;  %603 = vmatmul.bf16.vlgmr.msrb.gmra.mxu0 %v2783_v61 }
  0x7d   :  { %623 = vmatmul.bf16.gmra.mxu1 %v2850_v26  ;;  %742 = vmatmul.bf16.gmra.mxu2 %v2850_v26  ;;  %v221_v62 = vcvt.s32.f32 %v2996_v43 }
  0x7e   :  { %1206 = vmatpush.bf16.msrb.mxu0 %v2404_v39 }
  0x7f   :  { %1455 = vmatpush.bf16.msrb.mxu1 %v2409_v10  ;;  %1702 = vmatpush.bf16.msrb.mxu2 %v2416_v11 }
  0x82   :  { %1207 = vmatpush.bf16.msrb.mxu0 %v2403_v40  ;;  %v2991_v40 = vsub.f32 %v218_v23, %v272_v12 }
  0x83   :  { %1456 = vmatpush.bf16.msrb.mxu1 %v2408_v51  ;;  %1703 = vmatpush.bf16.msrb.mxu2 %v2415_v15 }
  0x84   :  { %vm480_vm4 = vcmp.ge.f32.partialorder %v2991_v40, 3.0  ;;  %vm810_vm6 = vcmp.ge.f32.partialorder %v2991_v40, 2.0 }
  0x86   :  { %1208 = vmatpush.bf16.msrb.mxu0 %v2402_v53 }
  0x87   :  { %1457 = vmatpush.bf16.msrb.mxu1 %v2407_v17  ;;  %1704 = vmatpush.bf16.msrb.mxu2 %v2414_v18  ;;  %v239_v17 = vmul.f32 0.083333336, %v221_v62  ;;  %v3036_v18 = vadd.s32 72, %v2966_v8 }
  0x8a   :  { %1209 = vmatpush.bf16.msrb.mxu0 %v2401_v9  ;;  %v273_v9 = vmul.f32 12.0, %v255_v42 }
  0x8b   :  { %1458 = vmatpush.bf16.msrb.mxu1 %v2406_v21  ;;  %1705 = vmatpush.bf16.msrb.mxu2 %v2413_v22 }
  0x8c   :  { %417 = vmatmul.bf16.gmra.mxu3 %v2895_v56  ;;  %608 = vmatmul.bf16.gmra.mxu0 %v2815_v2  ;;  %v3027_v13 = vsub.f32 %v219_v31, %v273_v9  ;;  %v257_v31 = vfloor.f32 %v239_v17 }
  0x8d   :  { %628 = vmatmul.bf16.gmra.mxu1 %v2895_v56  ;;  %747 = vmatmul.bf16.gmra.mxu2 %v2895_v56 }
  0x8e   :  { %1210 = vmatpush.bf16.msrb.mxu0 %v2400_v60  ;;  %v214_v60 = vcvt.s32.f32 %v2999_v44  ;;  %vm481_vm7 = vcmp.ge.f32.partialorder %v3027_v13, 3.0  ;;  %vm811_vm8 = vcmp.ge.f32.partialorder %v3027_v13, 2.0 }
  0x8f   :  { %1459 = vmatpush.bf16.msrb.mxu1 %v2405_v36 }
  0x90   :  { %v232_v15 = vmul.f32 0.083333336, %v214_v60 }
  0x92   :  { %1211 = vmatpush.bf16.msrb.mxu0 %v2399_v3  ;;  %v250_v46 = vfloor.f32 %v232_v15 }
  0x96   :  { %1212 = vmatpush.bf16.msrb.mxu0 %v2398_v38  ;;  %v3023_v38 = vadd.s32 16, %v2966_v8 }
  0x98   :  { %v215_v23 = vcvt.s32.f32 %v3023_v38 }
  0x9a   :  { %1213 = vmatpush.bf16.msrb.mxu0 %v2397_v35 }
  0x9c   :  { %422 = vmatmul.bf16.gmra.mxu3 %v2847_v63  ;;  %722 = vmatmul.bf16.vlgmr.msra.gmra.mxu0 %v2783_v61 }
  0x9d   :  { %633 = vmatmul.bf16.gmra.mxu1 %v2847_v63  ;;  %752 = vmatmul.bf16.gmra.mxu2 %v2847_v63 }
  0xac   :  { %427 = vmatmul.bf16.gmra.mxu3 %v2890_v54  ;;  %727 = vmatmul.bf16.gmra.mxu0 %v2815_v2 }
  0xad   :  { %638 = vmatmul.bf16.gmra.mxu1 %v2890_v54  ;;  %757 = vmatmul.bf16.gmra.mxu2 %v2890_v54 }
  0xbc   :  { %432 = vmatmul.bf16.gmra.mxu3 %v2925_v4  ;;  %1214 = vmatmul.bf16.vlgmr.msrb.gmra.mxu0 %v2783_v61 }
  0xbd   :  { %643 = vmatmul.bf16.gmra.mxu1 %v2925_v4  ;;  %762 = vmatmul.bf16.gmra.mxu2 %v2925_v4 }
  0xcc   :  { %968 = vmatmul.bf16.vlgmr.msrb.gmra.mxu3 %v2783_v61  ;;  %1219 = vmatmul.bf16.gmra.mxu0 %v2815_v2 }
  0xcd   :  { %1460 = vmatmul.bf16.vlgmr.msrb.gmra.mxu1 %v2783_v61  ;;  %1706 = vmatmul.bf16.vlgmr.msrb.gmra.mxu2 %v2783_v61  ;;  %v217_v61 = vcvt.s32.f32 %v199_v29 }
  0xcf   :  { %v235_v57 = vmul.f32 0.083333336, %v217_v61 }
  0xd1   :  { %v253_v19 = vfloor.f32 %v235_v57 }
  0xd3   :  { %v271_v6 = vmul.f32 12.0, %v253_v19 }
  0xd5   :  { %v3040_v22 = vsub.f32 %v217_v61, %v271_v6  ;;  %v222_v61 = vcvt.s32.f32 %v3036_v18 }
  0xd7   :  { %vm479_vm9 = vcmp.ge.f32.partialorder %v3040_v22, 3.0 }
  0xd9   :  { %v2974_v28 = vpop.f32.mrf.mxu0 }
  0xda   :  { %v2976_v47 = vpop.f32.mrf.mxu1  ;;  %v438_v48 = vrot.slane %v2974_v28, 5 }
  0xdc   :  { %973 = vmatmul.bf16.gmra.mxu3 %v2815_v2  ;;  %1224 = vmatmul.bf16.gmra.mxu0 %v2785_v20 }
  0xdd   :  { %1465 = vmatmul.bf16.gmra.mxu1 %v2815_v2  ;;  %1711 = vmatmul.bf16.gmra.mxu2 %v2815_v2  ;;  %v220_v2 = vcvt.s32.f32 %v2986_v33 }
  0xdf   :  { %v2983_v32 = vpop.f32.mrf.mxu3  ;;  %v238_v50 = vmul.f32 0.083333336, %v220_v2 }
  0xe0   :  { %v2988_v34 = vpop.f32.mrf.mxu2  ;;  %v442_v53 = vrot.slane %v2983_v32, 5 }
  0xe1   :  { %v395_v39 = vpop.f32.mrf.mxu0  ;;  %v772_v45 = vrot.slane %v2988_v34, 6  ;;  %v256_v30 = vfloor.f32 %v238_v50 }
  0xe2   :  { %v439_v59 = vrot.slane %v395_v39, 5  ;;  %v616_v52 = vpop.f32.mrf.mxu1 }
  0xe3   :  { %v274_v16 = vmul.f32 12.0, %v256_v30 }
  0xe4   :  { %v3005_v27 = vsel %vm456_vm3, %v438_v48, %v439_v59 }
  0xe7   :  { %v405_v49 = vpop.f32.mrf.mxu3 }
  0xe8   :  { %v443_v55 = vrot.slane %v405_v49, 5  ;;  %v735_v7 = vpop.f32.mrf.mxu2  ;;  %v268_v49 = vmul.f32 12.0, %v250_v46 }
  0xe9   :  { %v773_v10 = vrot.slane %v735_v7, 6  ;;  %v398_v24 = vpop.f32.mrf.mxu0  ;;  %v240_v7 = vmul.f32 0.083333336, %v222_v61 }
  0xea   :  { %v469_v0 = vsel %vm456_vm3, %v442_v53, %v443_v55  ;;  %v440_v3 = vrot.slane %v398_v24, 5  ;;  %v619_v11 = vpop.f32.mrf.mxu1 }
  0xeb   :  { %v534_v14 = vsel %vm480_vm4, %v469_v0, 0.0  ;;  %v799_v1 = vsel %vm786_vm5, %v772_v45, %v773_v10  ;;  %v258_v17 = vfloor.f32 %v240_v7 }
  0xec   :  { %v617_v35 = vadd.f32 %v616_v52, %v534_v14  ;;  %v864_v51 = vsel %vm810_vm6, %v799_v1, 0.0  ;;  %978 = vmatmul.bf16.gmra.mxu3 %v2785_v20  ;;  %1229 = vmatmul.bf16.gmra.mxu0 %v2817_v25  ;;  %v3044_v36 = vsel %vm456_vm3, %v439_v59, %v440_v3  ;;  %v3055_v59 = vsub.f32 %v220_v2, %v274_v16 }
  0xed   :  { %1470 = vmatmul.bf16.gmra.mxu1 %v2785_v20  ;;  %1716 = vmatmul.bf16.gmra.mxu2 %v2785_v20  ;;  %v233_v52 = vmul.f32 0.083333336, %v215_v23  ;;  %v3069_v2 = vadd.s32 24, %v2966_v8 }
  0xee   :  { %v3038_v21 = vadd.f32 %v864_v51, %v617_v35  ;;  %vm482_vm10 = vcmp.ge.f32.partialorder %v3055_v59, 3.0  ;;  %vm812_vm11 = vcmp.ge.f32.partialorder %v3055_v59, 2.0 }
  0xef   :  { %v408_v5 = vpop.f32.mrf.mxu3  ;;  %v216_v1 = vcvt.s32.f32 %v3069_v2 }
  0xf0   :  { %v444_v41 = vrot.slane %v408_v5, 5  ;;  %v738_v20 = vpop.f32.mrf.mxu2 }
  0xf1   :  { %v774_v29 = vrot.slane %v738_v20, 6  ;;  %v400_v58 = vpop.f32.mrf.mxu0 }
  0xf2   :  { %v468_v32 = vsel %vm456_vm3, %v443_v55, %v444_v41  ;;  %v441_v12 = vrot.slane %v400_v58, 5  ;;  %v621_v33 = vpop.f32.mrf.mxu1  ;;  %v275_v55 = vmul.f32 12.0, %v257_v31 }
  0xf3   :  { %v535_v37 = vsel %vm481_vm7, %v468_v32, 0.0  ;;  %v798_v39 = vsel %vm786_vm5, %v773_v10, %v774_v29  ;;  %v3105_v32 = vadd.s32 88, %v2966_v8 }
  0xf4   :  { %v620_v57 = vadd.f32 %v619_v11, %v535_v37  ;;  %v865_v42 = vsel %vm811_vm8, %v798_v39, 0.0  ;;  %v470_v19 = vsel %vm456_vm3, %v441_v12, %v442_v53  ;;  %v3073_v24 = vsel %vm456_vm3, %v440_v3, %v441_v12 }
  0xf5   :  { %v533_v50 = vsel %vm479_vm9, %v470_v19, 0.0  ;;  %v251_v53 = vfloor.f32 %v233_v52  ;;  %v3076_v11 = vadd.s32 80, %v2966_v8  ;;  %v3091_v15 = vsub.f32 %v221_v62, %v275_v55 }
  0xf6   :  { %v3063_v9 = vadd.f32 %v865_v42, %v620_v57  ;;  %v3066_v10 = vadd.f32 %v2976_v47, %v533_v50  ;;  %v3081_v47 = vsub.f32 %v214_v60, %v268_v49  ;;  %v276_v62 = vmul.f32 12.0, %v258_v17 }
  0xf7   :  { %v410_v0 = vpop.f32.mrf.mxu3  ;;  %v269_v60 = vmul.f32 12.0, %v251_v53  ;;  %v223_v16 = vcvt.s32.f32 %v3076_v11  ;;  %vm483_vm13 = vcmp.ge.f32.partialorder %v3091_v15, 3.0  ;;  %vm813_vm14 = vcmp.ge.f32.partialorder %v3091_v15, 2.0 }
  0xf8   :  { %v445_v6 = vrot.slane %v410_v0, 5  ;;  %v740_v14 = vpop.f32.mrf.mxu2  ;;  %vm476_vm12 = vcmp.ge.f32.partialorder %v3081_v47, 3.0  ;;  %v3119_v19 = vsub.f32 %v222_v61, %v276_v62  ;;  %v224_v50 = vcvt.s32.f32 %v3105_v32 }
  0xf9   :  { %v775_v30 = vrot.slane %v740_v14, 6  ;;  %v3085_v3 = vpop.f32.mrf.mxu0  ;;  %v530_v58 = vsel %vm476_vm12, %v3005_v27, 0.0  ;;  %v241_v31 = vmul.f32 0.083333336, %v223_v16  ;;  %v3110_v37 = vsub.f32 %v215_v23, %v269_v60 }
  0xfa   :  { %v467_v35 = vsel %vm456_vm3, %v444_v41, %v445_v6  ;;  %v624_v51 = vpop.f32.mrf.mxu1  ;;  %v234_v41 = vmul.f32 0.083333336, %v216_v1  ;;  %v242_v61 = vmul.f32 0.083333336, %v224_v50  ;;  %vm484_vm0 = vcmp.ge.f32.partialorder %v3119_v19, 3.0 }
  0xfb   :  { %v536_v5 = vsel %vm482_vm10, %v467_v35, 0.0  ;;  %v797_v44 = vsel %vm786_vm5, %v774_v29, %v775_v30  ;;  %v259_v23 = vfloor.f32 %v241_v31  ;;  %vm477_vm15 = vcmp.ge.f32.partialorder %v3110_v37, 3.0 }
  0xfc   :  { %v622_v20 = vadd.f32 %v621_v33, %v536_v5  ;;  %v866_v46 = vsel %vm812_vm11, %v797_v44, 0.0  ;;  %983 = vmatmul.bf16.gmra.mxu3 %v2817_v25  ;;  %1234 = vmatmul.bf16.gmra.mxu0 %v2850_v26  ;;  %v252_v39 = vfloor.f32 %v234_v41  ;;  %v531_v11 = vsel %vm477_vm15, %v3044_v36, 0.0 }
  0xfd   :  { %1475 = vmatmul.bf16.gmra.mxu1 %v2817_v25  ;;  %1721 = vmatmul.bf16.gmra.mxu2 %v2817_v25  ;;  %v277_v18 = vmul.f32 12.0, %v259_v23  ;;  %v207_v35 = vadd.s32 96, %v2966_v8  ;;  %vm814_vm1 = vcmp.ge.f32.partialorder %v3119_v19, 2.0  ;;  %v3150_v32 = vadd.s32 104, %v2966_v8 }
  0xfe   :  { %v3101_v43 = vadd.f32 %v866_v46, %v622_v20  ;;  %v270_v2 = vmul.f32 12.0, %v252_v39  ;;  %vm806_vm11 = vcmp.ge.f32.partialorder %v3081_v47, 2.0 }
  0xff   :  { %v413_v29 = vpop.f32.mrf.mxu3  ;;  %v3139_v46 = vsub.f32 %v223_v16, %v277_v18  ;;  %v226_v23 = vcvt.s32.f32 %v3150_v32 }
 0x100   :  { %v446_v12 = vrot.slane %v413_v29, 5  ;;  %v743_v33 = vpop.f32.mrf.mxu2  ;;  %v225_v29 = vcvt.s32.f32 %v207_v35 }
 0x101   :  { %v776_v25 = vrot.slane %v743_v33, 6  ;;  %v606_v52 = vpop.f32.mrf.mxu0  ;;  %vm485_vm4 = vcmp.ge.f32.partialorder %v3139_v46, 3.0  ;;  %vm815_vm6 = vcmp.ge.f32.partialorder %v3139_v46, 2.0 }
 0x102   :  { %v466_v27 = vsel %vm456_vm3, %v445_v6, %v446_v12  ;;  %v3115_v57 = vadd.f32 %v606_v52, %v530_v58  ;;  %v626_v42 = vpop.f32.mrf.mxu1 }
 0x103   :  { %v537_v49 = vsel %vm483_vm13, %v466_v27, 0.0  ;;  %v796_v38 = vsel %vm786_vm5, %v775_v30, %v776_v25  ;;  %v3129_v30 = vsub.f32 %v216_v1, %v270_v2  ;;  %v260_v1 = vfloor.f32 %v242_v61 }
 0x104   :  { %v625_v55 = vadd.f32 %v624_v51, %v537_v49  ;;  %v867_v7 = vsel %vm813_vm14, %v796_v38, 0.0  ;;  %v244_v61 = vmul.f32 0.083333336, %v226_v23  ;;  %vm807_vm14 = vcmp.ge.f32.partialorder %v3110_v37, 2.0 }
 0x105   :  { %vm478_vm2 = vcmp.ge.f32.partialorder %v3129_v30, 3.0  ;;  %v278_v39 = vmul.f32 12.0, %v260_v1 }
 0x106   :  { %v3125_v0 = vadd.f32 %v867_v7, %v625_v55  ;;  %v532_v16 = vsel %vm478_vm2, %v3073_v24, 0.0  ;;  %v262_v1 = vfloor.f32 %v244_v61  ;;  %vm809_vm2 = vcmp.ge.f32.partialorder %v3040_v22, 2.0 }
 0x107   :  { %v415_v53 = vpop.f32.mrf.mxu3  ;;  %v3161_v2 = vsub.f32 %v224_v50, %v278_v39 }
 0x108   :  { %v447_v6 = vrot.slane %v415_v53, 5  ;;  %v745_v14 = vpop.f32.mrf.mxu2  ;;  %v280_v39 = vmul.f32 12.0, %v262_v1  ;;  %v3209_v1 = vadd.s32 128, %v2966_v8 }
 0x109   :  { %v777_v51 = vrot.slane %v745_v14, 6  ;;  %v609_v17 = vpop.f32.mrf.mxu0  ;;  %vm486_vm7 = vcmp.ge.f32.partialorder %v3161_v2, 3.0  ;;  %vm816_vm8 = vcmp.ge.f32.partialorder %v3161_v2, 2.0 }
 0x10a   :  { %v465_v5 = vsel %vm456_vm3, %v446_v12, %v447_v6  ;;  %v3135_v44 = vadd.f32 %v609_v17, %v531_v11  ;;  %v629_v36 = vpop.f32.mrf.mxu1  ;;  %v3167_v17 = vadd.s32 112, %v2966_v8 }
 0x10b   :  { %v538_v60 = vsel %vm484_vm0, %v465_v5, 0.0  ;;  %v795_v20 = vsel %vm786_vm5, %v776_v25, %v777_v51  ;;  %v243_v25 = vmul.f32 0.083333336, %v225_v29 }
 0x10c   :  { %v627_v41 = vadd.f32 %v626_v42, %v538_v60  ;;  %v868_v62 = vsel %vm814_vm1, %v795_v20, 0.0  ;;  %988 = vmatmul.bf16.gmra.mxu3 %v2850_v26  ;;  %1239 = vmatmul.bf16.gmra.mxu0 %v2895_v56  ;;  %vm808_vm1 = vcmp.ge.f32.partialorder %v3129_v30, 2.0 }
 0x10d   :  { %1480 = vmatmul.bf16.gmra.mxu1 %v2850_v26  ;;  %1726 = vmatmul.bf16.gmra.mxu2 %v2850_v26  ;;  %v261_v53 = vfloor.f32 %v243_v25 }
 0x10e   :  { %v3146_v58 = vadd.f32 %v868_v62, %v627_v41 }
 0x10f   :  { %v418_v31 = vpop.f32.mrf.mxu3  ;;  %v279_v35 = vmul.f32 12.0, %v261_v53 }
 0x110   :  { %v448_v12 = vrot.slane %v418_v31, 5  ;;  %v748_v33 = vpop.f32.mrf.mxu2 }
 0x111   :  { %v778_v52 = vrot.slane %v748_v33, 6  ;;  %v611_v27 = vpop.f32.mrf.mxu0  ;;  %v3178_v31 = vsub.f32 %v225_v29, %v279_v35 }
 0x112   :  { %v464_v26 = vsel %vm456_vm3, %v447_v6, %v448_v12  ;;  %v3156_v42 = vadd.f32 %v611_v27, %v532_v16  ;;  %v631_v49 = vpop.f32.mrf.mxu1  ;;  %v227_v16 = vcvt.s32.f32 %v3167_v17 }
 0x113   :  { %v539_v24 = vsel %vm485_vm4, %v464_v26, 0.0  ;;  %v794_v38 = vsel %vm786_vm5, %v777_v51, %v778_v52  ;;  %vm487_vm9 = vcmp.ge.f32.partialorder %v3178_v31, 3.0  ;;  %vm817_vm10 = vcmp.ge.f32.partialorder %v3178_v31, 2.0 }
 0x114   :  { %v630_v55 = vadd.f32 %v629_v36, %v539_v24  ;;  %v869_v7 = vsel %vm815_vm6, %v794_v38, 0.0  ;;  %v245_v27 = vmul.f32 0.083333336, %v227_v16 }
 0x116   :  { %v3163_v11 = vadd.f32 %v869_v7, %v630_v55 }
 0x117   :  { %v420_v18 = vpop.f32.mrf.mxu3 }
 0x118   :  { %v449_v14 = vrot.slane %v420_v18, 5  ;;  %v750_v6 = vpop.f32.mrf.mxu2  ;;  %v3197_v18 = vsub.f32 %v226_v23, %v280_v39 }
 0x119   :  { %v779_v51 = vrot.slane %v750_v6, 6  ;;  %v3170_v5 = vpop.f32.mrf.mxu0 }
 0x11a   :  { %v463_v50 = vsel %vm456_vm3, %v448_v12, %v449_v14  ;;  %v634_v36 = vpop.f32.mrf.mxu1  ;;  %v3186_v12 = vadd.s32 120, %v2966_v8  ;;  %v768_v25 = vrot.slane %v3170_v5, 6  ;;  %vm488_vm12 = vcmp.ge.f32.partialorder %v3197_v18, 3.0 }
 0x11b   :  { %v540_v60 = vsel %vm486_vm7, %v463_v50, 0.0  ;;  %v793_v20 = vsel %vm786_vm5, %v778_v52, %v779_v51  ;;  %vm818_vm13 = vcmp.ge.f32.partialorder %v3197_v18, 2.0 }
 0x11c   :  { %v632_v41 = vadd.f32 %v631_v49, %v540_v60  ;;  %v870_v62 = vsel %vm816_vm8, %v793_v20, 0.0  ;;  %993 = vmatmul.bf16.gmra.mxu3 %v2895_v56  ;;  %1244 = vmatmul.bf16.gmra.mxu0 %v2847_v63  ;;  %v228_v55 = vcvt.s32.f32 %v3186_v12 }
 0x11d   :  { %1485 = vmatmul.bf16.gmra.mxu1 %v2895_v56  ;;  %1731 = vmatmul.bf16.gmra.mxu2 %v2895_v56 }
 0x11e   :  { %v3183_v32 = vadd.f32 %v870_v62, %v632_v41  ;;  %v246_v20 = vmul.f32 0.083333336, %v228_v55 }
 0x11f   :  { %v423_v33 = vpop.f32.mrf.mxu3 }
 0x120   :  { %v450_v52 = vrot.slane %v423_v33, 5  ;;  %v753_v29 = vpop.f32.mrf.mxu2 }
 0x121   :  { %v780_v26 = vrot.slane %v753_v29, 6  ;;  %v725_v49 = vpop.f32.mrf.mxu0  ;;  %v264_v29 = vfloor.f32 %v246_v20 }
 0x122   :  { %v462_v56 = vsel %vm456_vm3, %v449_v14, %v450_v52  ;;  %v636_v24 = vpop.f32.mrf.mxu1  ;;  %v769_v38 = vrot.slane %v725_v49, 6  ;;  %v263_v14 = vfloor.f32 %v245_v27  ;;  %v229_v27 = vcvt.s32.f32 %v3209_v1 }
 0x123   :  { %v541_v7 = vsel %vm487_vm9, %v462_v56, 0.0  ;;  %v792_v53 = vsel %vm786_vm5, %v779_v51, %v780_v26  ;;  %vm1278_vm9 = vcmp.lt.s32.totalorder %v2966_v8, 7 }
 0x124   :  { %v635_v61 = vadd.f32 %v634_v36, %v541_v7  ;;  %v871_v6 = vsel %vm817_vm10, %v792_v53, 0.0  ;;  %v803_v35 = vsel %vm786_vm5, %v768_v25, %v769_v38  ;;  %v281_v41 = vmul.f32 12.0, %v263_v14 }
 0x125   :  { %v860_v17 = vsel %vm806_vm11, %v803_v35, 0.0 }
 0x126   :  { %v3203_v50 = vadd.f32 %v871_v6, %v635_v61  ;;  %v3206_v60 = vadd.f32 %v860_v17, %v3115_v57  ;;  %v3223_v6 = vsub.f32 %v227_v16, %v281_v41  ;;  %v3235_v17 = vadd.s32 136, %v2966_v8 }
 0x127   :  { %v425_v23 = vpop.f32.mrf.mxu3 }
 0x128   :  { %v451_v51 = vrot.slane %v425_v23, 5  ;;  %v755_v36 = vpop.f32.mrf.mxu2  ;;  %vm489_vm15 = vcmp.ge.f32.partialorder %v3223_v6, 3.0  ;;  %vm819_vm0 = vcmp.ge.f32.partialorder %v3223_v6, 2.0 }
 0x129   :  { %v781_v62 = vrot.slane %v755_v36, 6  ;;  %v728_v12 = vpop.f32.mrf.mxu0 }
 0x12a   :  { %v461_v57 = vsel %vm456_vm3, %v450_v52, %v451_v51  ;;  %v639_v33 = vpop.f32.mrf.mxu1  ;;  %v770_v39 = vrot.slane %v728_v12, 6 }
 0x12b   :  { %v542_v49 = vsel %vm488_vm12, %v461_v57, 0.0  ;;  %v791_v56 = vsel %vm786_vm5, %v780_v26, %v781_v62 }
 0x12c   :  { %v637_v7 = vadd.f32 %v636_v24, %v542_v49  ;;  %v872_v53 = vsel %vm818_vm13, %v791_v56, 0.0  ;;  %v802_v61 = vsel %vm786_vm5, %v769_v38, %v770_v39  ;;  %998 = vmatmul.bf16.gmra.mxu3 %v2847_v63  ;;  %1249 = vmatmul.bf16.gmra.mxu0 %v2890_v54  ;;  %v282_v24 = vmul.f32 12.0, %v264_v29 }
 0x12d   :  { %v861_v52 = vsel %vm807_vm14, %v802_v61, 0.0  ;;  %1490 = vmatmul.bf16.gmra.mxu1 %v2847_v63  ;;  %1736 = vmatmul.bf16.gmra.mxu2 %v2847_v63  ;;  %v247_v38 = vmul.f32 0.083333336, %v229_v27  ;;  %v213_v56 = vcvt.s32.f32 %v2966_v8  ;;  %vm1298_vm14 = vcmp.le.f32.partialorder %v3081_v47, 10.0 }
 0x12e   :  { %v3227_v35 = vadd.f32 %v872_v53, %v637_v7  ;;  %v3230_v26 = vadd.f32 %v861_v52, %v3135_v44  ;;  %v3243_v12 = vsub.f32 %v228_v55, %v282_v24  ;;  %v230_v7 = vcvt.s32.f32 %v3235_v17 }
 0x12f   :  { %v428_v14 = vpop.f32.mrf.mxu3  ;;  %v265_v57 = vfloor.f32 %v247_v38  ;;  %v231_v17 = vmul.f32 0.083333336, %v213_v56 }
 0x130   :  { %4047 = vst [vmem:[#allocation2_spill] sm:$0xff] %v3227_v35  ;;  %v452_v16 = vrot.slane %v428_v14, 5  ;;  %v758_v20 = vpop.f32.mrf.mxu2  ;;  %vm490_vm4 = vcmp.ge.f32.partialorder %v3243_v12, 3.0  ;;  %vm820_vm6 = vcmp.ge.f32.partialorder %v3243_v12, 2.0 }
 0x131   :  { %v782_v23 = vrot.slane %v758_v20, 6  ;;  %v730_v63 = vpop.f32.mrf.mxu0  ;;  %4048 = vst [vmem:[#allocation3_spill] sm:$0xff] %v3243_v12 }
 0x132   :  { %v460_v44 = vsel %vm456_vm3, %v451_v51, %v452_v16  ;;  %v641_v36 = vpop.f32.mrf.mxu1  ;;  %v771_v41 = vrot.slane %v730_v63, 6  ;;  %v248_v63 = vmul.f32 0.083333336, %v230_v7 }
 0x133   :  { %v543_v29 = vsel %vm489_vm15, %v460_v44, 0.0  ;;  %v790_v49 = vsel %vm786_vm5, %v781_v62, %v782_v23  ;;  %vm1052_vm15 = vcmp.ge.f32.partialorder %v3081_v47, 1.0 }
 0x134   :  { %v640_v53 = vadd.f32 %v639_v33, %v543_v29  ;;  %v873_v61 = vsel %vm819_vm0, %v790_v49, 0.0  ;;  %v800_v51 = vsel %vm786_vm5, %v771_v41, %v772_v45  ;;  %v801_v55 = vsel %vm786_vm5, %v770_v39, %v771_v41 }
 0x135   :  { %v862_v52 = vsel %vm808_vm1, %v801_v55, 0.0  ;;  %v863_v24 = vsel %vm809_vm2, %v800_v51, 0.0  ;;  %v283_v45 = vmul.f32 12.0, %v265_v57  ;;  %v249_v49 = vfloor.f32 %v231_v17 }
 0x136   :  { %v3255_v38 = vadd.f32 %v873_v61, %v640_v53  ;;  %v3258_v62 = vadd.f32 %v862_v52, %v3156_v42  ;;  %v3261_v14 = vadd.f32 %v863_v24, %v3066_v10  ;;  %v266_v51 = vfloor.f32 %v248_v63 }
 0x137   :  { %v430_v33 = vpop.f32.mrf.mxu3  ;;  %v3275_v57 = vsub.f32 %v229_v27, %v283_v45  ;;  %vm1770_vm0 = vcmp.lt.s32.totalorder %v2966_v8, 5  ;;  %vm1544_vm1 = vcmp.le.f32.partialorder %v3081_v47, 9.0  ;;  %vm1299_vm2 = vcmp.le.f32.partialorder %v3110_v37, 10.0 }
 0x138   :  { %4049 = vst [vmem:[#allocation4_spill] sm:$0xff] %v3255_v38  ;;  %v453_v20 = vrot.slane %v430_v33, 5  ;;  %v760_v34 = vpop.f32.mrf.mxu2  ;;  %v284_v33 = vmul.f32 12.0, %v266_v51 }
 0x139   :  { %v783_v44 = vrot.slane %v760_v34, 6  ;;  %v3265_v39 = vpop.f32.mrf.mxu0  ;;  %4050 = vst [vmem:[#allocation5_spill] sm:$0xff] %v3275_v57  ;;  %vm491_vm7 = vcmp.ge.f32.partialorder %v3275_v57, 3.0  ;;  %vm821_vm8 = vcmp.ge.f32.partialorder %v3275_v57, 2.0 }
 0x13a   :  { %v459_v42 = vsel %vm456_vm3, %v452_v16, %v453_v20  ;;  %v644_v41 = vpop.f32.mrf.mxu1 }
 0x13b   :  { %v544_v29 = vsel %vm490_vm4, %v459_v42, 0.0  ;;  %v789_v10 = vsel %vm786_vm5, %v782_v23, %v783_v44  ;;  %v267_v23 = vmul.f32 12.0, %v249_v49  ;;  %vm1053_vm4 = vcmp.ge.f32.partialorder %v3110_v37, 1.0 }
 0x13c   :  { %v642_v53 = vadd.f32 %v641_v36, %v544_v29  ;;  %v874_v61 = vsel %vm820_vm6, %v789_v10, 0.0  ;;  %1003 = vmatmul.bf16.gmra.mxu3 %v2890_v54  ;;  %1254 = vmatmul.bf16.gmra.mxu0 %v2925_v4  ;;  %v4033_v36 = vrot.slane %v3265_v39, 1  ;;  %vm1790_vm6 = vcmp.le.f32.partialorder %v3081_v47, 8.0 }
 0x13d   :  { %1495 = vmatmul.bf16.gmra.mxu1 %v2890_v54  ;;  %1741 = vmatmul.bf16.gmra.mxu2 %v2890_v54  ;;  %v3288_v42 = vsub.f32 %v213_v56, %v267_v23 }
 0x13e   :  { %v3279_v16 = vadd.f32 %v874_v61, %v642_v53  ;;  %v3297_v53 = vsub.f32 %v230_v7, %v284_v33 }
 0x13f   :  { %v433_v55 = vpop.f32.mrf.mxu3  ;;  %vm475_vm10 = vcmp.ge.f32.partialorder %v3288_v42, 3.0  ;;  %vm805_vm12 = vcmp.ge.f32.partialorder %v3288_v42, 2.0 }
 0x140   :  { %4051 = vst [vmem:[#allocation6_spill] sm:$0xff] %v3279_v16  ;;  %v454_v52 = vrot.slane %v433_v55, 5  ;;  %v763_v24 = vpop.f32.mrf.mxu2  ;;  %vm492_vm11 = vcmp.ge.f32.partialorder %v3297_v53, 3.0  ;;  %vm822_vm13 = vcmp.ge.f32.partialorder %v3297_v53, 2.0 }
 0x141   :  { %v784_v17 = vrot.slane %v763_v24, 6  ;;  %v1217_v1 = vpop.f32.mrf.mxu0 }
 0x142   :  { %v458_v27 = vsel %vm456_vm3, %v453_v20, %v454_v52  ;;  %v646_v34 = vpop.f32.mrf.mxu1  ;;  %v1261_v54 = vrot.slane %v1217_v1, 1 }
 0x143   :  { %v545_v45 = vsel %vm491_vm7, %v458_v27, 0.0  ;;  %v788_v63 = vsel %vm786_vm5, %v783_v44, %v784_v17  ;;  %vm1545_vm7 = vcmp.le.f32.partialorder %v3110_v37, 9.0 }
 0x144   :  { %v645_v29 = vadd.f32 %v644_v41, %v545_v45  ;;  %v875_v10 = vsel %vm821_vm8, %v788_v63, 0.0  ;;  %v3295_v49 = vsel %vm1278_vm9, %v4033_v36, %v1261_v54  ;;  %vm1300_vm8 = vcmp.le.f32.partialorder %v3129_v30, 10.0 }
 0x146   :  { %v3299_v20 = vadd.f32 %v875_v10, %v645_v29 }
 0x147   :  { %v435_v61 = vpop.f32.mrf.mxu3 }
 0x148   :  { %4052 = vst [vmem:[#allocation7_spill] sm:$0xff] %v3299_v20  ;;  %v455_v51 = vrot.slane %v435_v61, 5  ;;  %v765_v56 = vpop.f32.mrf.mxu2 }
 0x149   :  { %v785_v44 = vrot.slane %v765_v56, 6  ;;  %v1220_v41 = vpop.f32.mrf.mxu0 }
 0x14a   :  { %v457_v55 = vsel %vm456_vm3, %v454_v52, %v455_v51  ;;  %v474_v7 = vsel %vm456_vm3, %v455_v51, %v438_v48  ;;  %v1262_v23 = vrot.slane %v1220_v41, 1  ;;  %v3311_v24 = vpop.f32.mrf.mxu1  ;;  %vm1524_vm3 = vcmp.lt.s32.totalorder %v2966_v8, 6 }
 0x14b   :  { %v529_v33 = vsel %vm475_vm10, %v474_v7, 0.0  ;;  %v546_v1 = vsel %vm492_vm11, %v457_v55, 0.0  ;;  %v787_v27 = vsel %vm786_vm5, %v784_v17, %v785_v44  ;;  %v804_v45 = vsel %vm786_vm5, %v785_v44, %v768_v25 }
 0x14c   :  { %v605_v52 = vadd.f32 %v3085_v3, %v529_v33  ;;  %v647_v63 = vadd.f32 %v646_v34, %v546_v1  ;;  %v859_v28 = vsel %vm805_vm12, %v804_v45, 0.0  ;;  %v876_v29 = vsel %vm822_vm13, %v787_v27, 0.0  ;;  %1008 = vmatmul.bf16.gmra.mxu3 %v2925_v4 }
 0x14d   :  { %v1294_v48 = vsel %vm1278_vm9, %v1261_v54, %v1262_v23  ;;  %1500 = vmatmul.bf16.gmra.mxu1 %v2925_v4  ;;  %1746 = vmatmul.bf16.gmra.mxu2 %v2925_v4  ;;  %v4030_v3 = vrot.slane %v3311_v24, 2  ;;  %vm1032_vm5 = vcmp.lt.s32.totalorder %v2966_v8, 1  ;;  %vm1054_vm10 = vcmp.ge.f32.partialorder %v3129_v30, 1.0 }
 0x14e   :  { %v3325_v17 = vadd.f32 %v859_v28, %v605_v52  ;;  %v3327_v5 = vadd.f32 %v876_v29, %v647_v63  ;;  %v1352_v63 = vsel %vm1298_vm14, %v1294_v48, 0.0  ;;  %vm1791_vm11 = vcmp.le.f32.partialorder %v3110_v37, 8.0 }
 0x14f   :  { %v3329_v10 = vpop.f32.mrf.mxu3  ;;  %vm1546_vm12 = vcmp.le.f32.partialorder %v3129_v30, 9.0  ;;  %vm1301_vm13 = vcmp.le.f32.partialorder %v3040_v22, 10.0  ;;  %vm1055_vm14 = vcmp.ge.f32.partialorder %v3040_v22, 1.0 }
 0x150   :  { %v3331_v25 = vpop.f32.mrf.mxu2  ;;  %v4031_v55 = vrot.slane %v3329_v10, 7 }
 0x151   :  { %v1222_v34 = vpop.f32.mrf.mxu0  ;;  %v4032_v44 = vrot.slane %v3331_v25, 3 }
 0x152   :  { %v1263_v61 = vrot.slane %v1222_v34, 1  ;;  %v1463_v51 = vpop.f32.mrf.mxu1 }
 0x153   :  { %v1507_v56 = vrot.slane %v1463_v51, 2 }
 0x154   :  { %v1293_v54 = vsel %vm1278_vm9, %v1262_v23, %v1263_v61 }
 0x155   :  { %v3341_v4 = vsel %vm1524_vm3, %v4030_v3, %v1507_v56 }
 0x157   :  { %v971_v41 = vpop.f32.mrf.mxu3 }
 0x158   :  { %v1015_v7 = vrot.slane %v971_v41, 7  ;;  %v1709_v23 = vpop.f32.mrf.mxu2 }
 0x159   :  { %v1753_v33 = vrot.slane %v1709_v23, 3  ;;  %v1225_v1 = vpop.f32.mrf.mxu0 }
 0x15a   :  { %v1049_v27 = vsel %vm1032_vm5, %v4031_v55, %v1015_v7  ;;  %v1264_v45 = vrot.slane %v1225_v1, 1  ;;  %v1466_v52 = vpop.f32.mrf.mxu1 }
 0x15b   :  { %v1106_v28 = vsel %vm1052_vm15, %v1049_v27, 0.0  ;;  %v3358_v29 = vsel %vm1770_vm0, %v4032_v44, %v1753_v33  ;;  %v1508_v34 = vrot.slane %v1466_v52, 2  ;;  %vm1792_vm15 = vcmp.le.f32.partialorder %v3129_v30, 8.0 }
 0x15c   :  { %v1124_v51 = vadd.f32 %v1106_v28, %v3206_v60  ;;  %v1292_v41 = vsel %vm1278_vm9, %v1263_v61, %v1264_v45 }
 0x15d   :  { %v1540_v23 = vsel %vm1524_vm3, %v1507_v56, %v1508_v34  ;;  %v1353_v56 = vsel %vm1299_vm2, %v1293_v54, 0.0  ;;  %vm1302_vm2 = vcmp.le.f32.partialorder %v2991_v40, 10.0 }
 0x15e   :  { %v1370_v1 = vadd.f32 %v1352_v63, %v1124_v51  ;;  %v1598_v3 = vsel %vm1544_vm1, %v1540_v23, 0.0  ;;  %vm1547_vm1 = vcmp.le.f32.partialorder %v3040_v22, 9.0 }
 0x15f   :  { %v974_v55 = vpop.f32.mrf.mxu3 }
 0x160   :  { %v1616_v48 = vadd.f32 %v1598_v3, %v1370_v1  ;;  %v1016_v27 = vrot.slane %v974_v55, 7  ;;  %v1712_v44 = vpop.f32.mrf.mxu2 }
 0x161   :  { %v1754_v36 = vrot.slane %v1712_v44, 3  ;;  %v1227_v60 = vpop.f32.mrf.mxu0 }
 0x162   :  { %v1048_v61 = vsel %vm1032_vm5, %v1015_v7, %v1016_v27  ;;  %v1265_v52 = vrot.slane %v1227_v60, 1  ;;  %v1468_v28 = vpop.f32.mrf.mxu1 }
 0x163   :  { %v1107_v63 = vsel %vm1053_vm4, %v1048_v61, 0.0  ;;  %v1786_v3 = vsel %vm1770_vm0, %v1753_v33, %v1754_v36  ;;  %v1509_v55 = vrot.slane %v1468_v28, 2  ;;  %vm1056_vm4 = vcmp.ge.f32.partialorder %v2991_v40, 1.0 }
 0x164   :  { %v1125_v51 = vadd.f32 %v1107_v63, %v3230_v26  ;;  %v1844_v23 = vsel %vm1790_vm6, %v1786_v3, 0.0  ;;  %v1291_v47 = vsel %vm1278_vm9, %v1264_v45, %v1265_v52  ;;  %vm1793_vm6 = vcmp.le.f32.partialorder %v3040_v22, 8.0 }
 0x165   :  { %v3376_v44 = vadd.f32 %v1844_v23, %v1616_v48  ;;  %v1539_v7 = vsel %vm1524_vm3, %v1508_v34, %v1509_v55 }
 0x166   :  { %v1371_v1 = vadd.f32 %v1353_v56, %v1125_v51  ;;  %v1599_v60 = vsel %vm1545_vm7, %v1539_v7, 0.0  ;;  %v1354_v56 = vsel %vm1300_vm8, %v1292_v41, 0.0  ;;  %vm1548_vm7 = vcmp.le.f32.partialorder %v2991_v40, 9.0 }
 0x167   :  { %v976_v20 = vpop.f32.mrf.mxu3  ;;  %vm1303_vm8 = vcmp.le.f32.partialorder %v3027_v13, 10.0 }
 0x168   :  { %v1617_v54 = vadd.f32 %v1599_v60, %v1371_v1  ;;  %v1017_v61 = vrot.slane %v976_v20, 7  ;;  %v1714_v33 = vpop.f32.mrf.mxu2 }
 0x169   :  { %v1755_v26 = vrot.slane %v1714_v33, 3  ;;  %v3383_v28 = vpop.f32.mrf.mxu0 }
 0x16a   :  { %v1047_v45 = vsel %vm1032_vm5, %v1016_v27, %v1017_v61  ;;  %v1266_v34 = vrot.slane %v3383_v28, 1  ;;  %v1471_v48 = vpop.f32.mrf.mxu1 }
 0x16b   :  { %v1108_v63 = vsel %vm1054_vm10, %v1047_v45, 0.0  ;;  %v1785_v20 = vsel %vm1770_vm0, %v1754_v36, %v1755_v26  ;;  %v1510_v3 = vrot.slane %v1471_v48, 2  ;;  %vm1057_vm10 = vcmp.ge.f32.partialorder %v3027_v13, 1.0 }
 0x16c   :  { %v1126_v51 = vadd.f32 %v1108_v63, %v3258_v62  ;;  %v1845_v23 = vsel %vm1791_vm11, %v1785_v20, 0.0  ;;  %v1290_v37 = vsel %vm1278_vm9, %v1265_v52, %v1266_v34  ;;  %vm1794_vm11 = vcmp.le.f32.partialorder %v2991_v40, 8.0 }
 0x16d   :  { %v3394_v7 = vadd.f32 %v1845_v23, %v1617_v54  ;;  %v1538_v27 = vsel %vm1524_vm3, %v1509_v55, %v1510_v3  ;;  %v1355_v55 = vsel %vm1301_vm13, %v1291_v47, 0.0  ;;  %vm1058_vm13 = vcmp.ge.f32.partialorder %v3055_v59, 1.0 }
 0x16e   :  { %v1372_v1 = vadd.f32 %v1354_v56, %v1126_v51  ;;  %v1600_v60 = vsel %vm1546_vm12, %v1538_v27, 0.0  ;;  %vm1549_vm12 = vcmp.le.f32.partialorder %v3027_v13, 9.0 }
 0x16f   :  { %v979_v33 = vpop.f32.mrf.mxu3 }
 0x170   :  { %v1618_v41 = vadd.f32 %v1600_v60, %v1372_v1  ;;  %v1018_v28 = vrot.slane %v979_v33, 7  ;;  %v1717_v36 = vpop.f32.mrf.mxu2 }
 0x171   :  { %v1756_v62 = vrot.slane %v1717_v36, 3  ;;  %v3401_v45 = vpop.f32.mrf.mxu0 }
 0x172   :  { %v1046_v52 = vsel %vm1032_vm5, %v1017_v61, %v1018_v28  ;;  %v1473_v54 = vpop.f32.mrf.mxu1 }
 0x173   :  { %v1109_v48 = vsel %vm1055_vm14, %v1046_v52, 0.0  ;;  %v1784_v56 = vsel %vm1770_vm0, %v1755_v26, %v1756_v62  ;;  %v1511_v63 = vrot.slane %v1473_v54, 2  ;;  %vm1795_vm14 = vcmp.le.f32.partialorder %v3027_v13, 8.0 }
 0x174   :  { %v1127_v20 = vadd.f32 %v1109_v48, %v3261_v14  ;;  %v1846_v51 = vsel %vm1792_vm15, %v1784_v56, 0.0  ;;  %v4036_v48 = vrot.slane %v3401_v45, 1  ;;  %vm1059_vm15 = vcmp.ge.f32.partialorder %v3091_v15, 1.0 }
 0x175   :  { %v3409_v23 = vadd.f32 %v1846_v51, %v1618_v41  ;;  %v1537_v30 = vsel %vm1524_vm3, %v1510_v3, %v1511_v63  ;;  %v1356_v3 = vsel %vm1302_vm2, %v1290_v37, 0.0  ;;  %vm1061_vm2 = vcmp.ge.f32.partialorder %v3139_v46, 1.0 }
 0x176   :  { %v1373_v27 = vadd.f32 %v1355_v55, %v1127_v20  ;;  %v1601_v1 = vsel %vm1547_vm1, %v1537_v30, 0.0  ;;  %vm1060_vm1 = vcmp.ge.f32.partialorder %v3119_v19, 1.0 }
 0x177   :  { %v981_v61 = vpop.f32.mrf.mxu3 }
 0x178   :  { %v1619_v60 = vadd.f32 %v1601_v1, %v1373_v27  ;;  %v1019_v47 = vrot.slane %v981_v61, 7  ;;  %v1719_v33 = vpop.f32.mrf.mxu2 }
 0x179   :  { %v1757_v26 = vrot.slane %v1719_v33, 3  ;;  %v3416_v14 = vpop.f32.mrf.mxu0 }
 0x17a   :  { %v1045_v41 = vsel %vm1032_vm5, %v1018_v28, %v1019_v47  ;;  %v1476_v36 = vpop.f32.mrf.mxu1 }
 0x17b   :  { %v1110_v52 = vsel %vm1056_vm4, %v1045_v41, 0.0  ;;  %v1783_v54 = vsel %vm1770_vm0, %v1756_v62, %v1757_v26  ;;  %v1512_v55 = vrot.slane %v1476_v36, 2  ;;  %v1289_v62 = vsel %vm1278_vm9, %v1266_v34, %v4036_v48 }
 0x17c   :  { %v1128_v56 = vadd.f32 %v1110_v52, %v3038_v21  ;;  %v1847_v20 = vsel %vm1793_vm6, %v1783_v54, 0.0  ;;  %v1357_v33 = vsel %vm1303_vm8, %v1289_v62, 0.0  ;;  %vm1062_vm4 = vcmp.ge.f32.partialorder %v3161_v2, 1.0 }
 0x17d   :  { %v3425_v22 = vadd.f32 %v1847_v20, %v1619_v60  ;;  %v1536_v51 = vsel %vm1524_vm3, %v1511_v63, %v1512_v55  ;;  %vm1063_vm6 = vcmp.ge.f32.partialorder %v3178_v31, 1.0  ;;  %vm1305_vm8 = vcmp.le.f32.partialorder %v3091_v15, 10.0 }
 0x17e   :  { %v1374_v28 = vadd.f32 %v1356_v3, %v1128_v56  ;;  %v1602_v30 = vsel %vm1548_vm7, %v1536_v51, 0.0  ;;  %vm1304_vm7 = vcmp.le.f32.partialorder %v3055_v59, 10.0 }
 0x17f   :  { %v984_v37 = vpop.f32.mrf.mxu3 }
 0x180   :  { %v1620_v27 = vadd.f32 %v1602_v30, %v1374_v28  ;;  %v1020_v1 = vrot.slane %v984_v37, 7  ;;  %v1722_v21 = vpop.f32.mrf.mxu2 }
 0x181   :  { %v1758_v61 = vrot.slane %v1722_v21, 3  ;;  %v3443_v36 = vpop.f32.mrf.mxu0 }
 0x182   :  { %v1044_v63 = vsel %vm1032_vm5, %v1019_v47, %v1020_v1  ;;  %v3438_v60 = vpop.f32.mrf.mxu1 }
 0x183   :  { %v1111_v41 = vsel %vm1057_vm10, %v1044_v63, 0.0  ;;  %v1782_v34 = vsel %vm1770_vm0, %v1757_v26, %v1758_v61  ;;  %v4035_v3 = vrot.slane %v3438_v60, 2  ;;  %vm1297_vm10 = vcmp.le.f32.partialorder %v3288_v42, 10.0 }
 0x184   :  { %v1129_v52 = vadd.f32 %v1111_v41, %v3063_v9  ;;  %v1848_v54 = vsel %vm1794_vm11, %v1782_v34, 0.0  ;;  %vm1543_vm11 = vcmp.le.f32.partialorder %v3288_v42, 9.0 }
 0x185   :  { %v3447_v40 = vadd.f32 %v1848_v54, %v1620_v27  ;;  %v1535_v47 = vsel %vm1524_vm3, %v1512_v55, %v4035_v3 }
 0x186   :  { %v1375_v56 = vadd.f32 %v1357_v33, %v1129_v52  ;;  %v1603_v20 = vsel %vm1549_vm12, %v1535_v47, 0.0  ;;  %vm1789_vm12 = vcmp.le.f32.partialorder %v3288_v42, 8.0 }
 0x187   :  { %v986_v51 = vpop.f32.mrf.mxu3 }
 0x188   :  { %v1621_v28 = vadd.f32 %v1603_v20, %v1375_v56  ;;  %v1021_v30 = vrot.slane %v986_v51, 7  ;;  %v3454_v26 = vpop.f32.mrf.mxu2 }
 0x189   :  { %v4034_v37 = vrot.slane %v3454_v26, 3  ;;  %v3471_v41 = vpop.f32.mrf.mxu0 }
 0x18a   :  { %v1043_v9 = vsel %vm1032_vm5, %v1020_v1, %v1021_v30  ;;  %v3460_v62 = vpop.f32.mrf.mxu1 }
 0x18b   :  { %v1112_v27 = vsel %vm1058_vm13, %v1043_v9, 0.0  ;;  %v1781_v55 = vsel %vm1770_vm0, %v1758_v61, %v4034_v37  ;;  %vm1550_vm13 = vcmp.le.f32.partialorder %v3055_v59, 9.0 }
 0x18c   :  { %v3467_v21 = vadd.f32 %v1112_v27, %v3101_v43  ;;  %v1849_v63 = vsel %vm1795_vm14, %v1781_v55, 0.0  ;;  %vm1551_vm14 = vcmp.le.f32.partialorder %v3091_v15, 9.0 }
 0x18d   :  { %v3469_v33 = vadd.f32 %v1849_v63, %v1621_v28 }
 0x18f   :  { %v989_v13 = vpop.f32.mrf.mxu3 }
 0x190   :  { %v1022_v34 = vrot.slane %v989_v13, 7  ;;  %v3474_v1 = vpop.f32.mrf.mxu2 }
 0x191   :  { %v3483_v47 = vpop.f32.mrf.mxu0 }
 0x192   :  { %v1042_v52 = vsel %vm1032_vm5, %v1021_v30, %v1022_v34  ;;  %v3478_v54 = vpop.f32.mrf.mxu1 }
 0x193   :  { %v1113_v61 = vsel %vm1059_vm15, %v1042_v52, 0.0  ;;  %vm1796_vm15 = vcmp.le.f32.partialorder %v3055_v59, 8.0  ;;  %v3609_v59 = vmul.f32 %v3376_v44, %v3376_v44 }
 0x194   :  { %v3481_v43 = vadd.f32 %v1113_v61, %v3125_v0 }
 0x197   :  { %v991_v56 = vpop.f32.mrf.mxu3 }
 0x198   :  { %v1023_v20 = vrot.slane %v991_v56, 7  ;;  %v3486_v51 = vpop.f32.mrf.mxu2 }
 0x199   :  { %v3498_v13 = vpop.f32.mrf.mxu0 }
 0x19a   :  { %v1041_v28 = vsel %vm1032_vm5, %v1022_v34, %v1023_v20  ;;  %v3490_v9 = vpop.f32.mrf.mxu1 }
 0x19b   :  { %v1114_v30 = vsel %vm1060_vm1, %v1041_v28, 0.0  ;;  %vm1797_vm1 = vcmp.le.f32.partialorder %v3091_v15, 8.0  ;;  %v3618_v15 = vmul.f32 %v3409_v23, %v3409_v23 }
 0x19c   :  { %v3493_v27 = vadd.f32 %v1114_v30, %v3146_v58 }
 0x19f   :  { %v994_v55 = vpop.f32.mrf.mxu3 }
 0x1a0   :  { %v1024_v0 = vrot.slane %v994_v55, 7  ;;  %v3496_v63 = vpop.f32.mrf.mxu2 }
 0x1a1   :  { %v3514_v3 = vpop.f32.mrf.mxu0 }
 0x1a2   :  { %v1040_v52 = vsel %vm1032_vm5, %v1023_v20, %v1024_v0  ;;  %v3502_v61 = vpop.f32.mrf.mxu1 }
 0x1a3   :  { %v1115_v34 = vsel %vm1061_vm2, %v1040_v52, 0.0  ;;  %vm1306_vm2 = vcmp.le.f32.partialorder %v3119_v19, 10.0 }
 0x1a4   :  { %v3505_v56 = vadd.f32 %v1115_v34, %v3163_v11 }
 0x1a7   :  { %v996_v28 = vpop.f32.mrf.mxu3 }
 0x1a8   :  { %v1025_v58 = vrot.slane %v996_v28, 7  ;;  %v3508_v30 = vpop.f32.mrf.mxu2 }
 0x1aa   :  { %v1039_v55 = vsel %vm1032_vm5, %v1024_v0, %v1025_v58  ;;  %v3512_v37 = vpop.f32.mrf.mxu1 }
 0x1ab   :  { %v1116_v20 = vsel %vm1062_vm4, %v1039_v55, 0.0  ;;  %vm1307_vm4 = vcmp.le.f32.partialorder %v3139_v46, 10.0 }
 0x1ac   :  { %v3517_v48 = vadd.f32 %v1116_v20, %v3183_v32  ;;  %v3534_v32 = vpop.f32.mrf.mxu0 }
 0x1af   :  { %v3519_v52 = vpop.f32.mrf.mxu3 }
 0x1b0   :  { %4053 = vst [vmem:[#allocation8_spill] sm:$0xff] %v3519_v52  ;;  %v4042_v11 = vrot.slane %v3519_v52, 7  ;;  %v3523_v34 = vpop.f32.mrf.mxu2 }
 0x1b2   :  { %v1038_v0 = vsel %vm1032_vm5, %v1025_v58, %v4042_v11  ;;  %v3529_v28 = vpop.f32.mrf.mxu1  ;;  %v1268_v58 = vrot.slane %v3416_v14, 1  ;;  %v1515_v14 = vrot.slane %v3478_v54, 2  ;;  %v4062_v54 = vrot.slane %v3438_v60, 2 }
 0x1b3   :  { %v1117_v16 = vsel %vm1063_vm6, %v1038_v0, 0.0  ;;  %v1269_v0 = vrot.slane %v3443_v36, 1  ;;  %v3589_v60 = vsel %vm1789_vm12, %v3358_v29, 0.0  ;;  %vm1552_vm6 = vcmp.le.f32.partialorder %v3119_v19, 9.0 }
 0x1b4   :  { %v3532_v55 = vadd.f32 %v1117_v16, %v3203_v50  ;;  %v3542_v57 = vpop.f32.mrf.mxu0  ;;  %v4059_v16 = vrot.slane %v3401_v45, 1  ;;  %v1760_v45 = vrot.slane %v3474_v1, 3  ;;  %vm1554_vm12 = vcmp.le.f32.partialorder %v3161_v2, 9.0 }
 0x1b6   :  { %4054 = vst [vmem:[#allocation9_spill] sm:$0xff] %v3532_v55  ;;  %v1288_v11 = vsel %vm1278_vm9, %v4059_v16, %v1268_v58  ;;  %v1287_v55 = vsel %vm1278_vm9, %v1268_v58, %v1269_v0 }
 0x1b7   :  { %v3536_v20 = vpop.f32.mrf.mxu3  ;;  %v1358_v16 = vsel %vm1304_vm7, %v1288_v11, 0.0  ;;  %v1359_v58 = vsel %vm1305_vm8, %v1287_v55, 0.0  ;;  %v3583_v11 = vsel %vm1543_vm11, %v3341_v4, 0.0  ;;  %v4063_v55 = vrot.slane %v3454_v26, 3 }
 0x1b8   :  { %v3538_v38 = vpop.f32.mrf.mxu2  ;;  %vm1308_vm7 = vcmp.le.f32.partialorder %v3161_v2, 10.0  ;;  %vm1798_vm8 = vcmp.le.f32.partialorder %v3119_v19, 8.0  ;;  %vm1799_vm11 = vcmp.le.f32.partialorder %v3139_v46, 8.0 }
 0x1b9   :  { %4055 = vst [vmem:[#allocation10_spill] sm:$0xff] %v3538_v38 }
 0x1ba   :  { %v3540_v35 = vpop.f32.mrf.mxu1 }
 0x1bb   :  { %4056 = vst [vmem:[#allocation11_spill] sm:$0xff] %v3540_v35  ;;  %v1514_v35 = vrot.slane %v3460_v62, 2  ;;  %v1761_v62 = vrot.slane %v3486_v51, 3 }
 0x1bc   :  { %v3577_v1 = vpop.f32.mrf.mxu0 }
 0x1bd   :  { %v1534_v38 = vsel %vm1524_vm3, %v4062_v54, %v1514_v35  ;;  %v1533_v51 = vsel %vm1524_vm3, %v1514_v35, %v1515_v14  ;;  %v1780_v54 = vsel %vm1770_vm0, %v4063_v55, %v1760_v45  ;;  %v1779_v35 = vsel %vm1770_vm0, %v1760_v45, %v1761_v62 }
 0x1be   :  { %v1604_v4 = vsel %vm1550_vm13, %v1534_v38, 0.0  ;;  %v1605_v26 = vsel %vm1551_vm14, %v1533_v51, 0.0  ;;  %v3613_v38 = vmul.f32 %v3394_v7, %v3394_v7  ;;  %v1271_v45 = vrot.slane %v3483_v47, 1 }
 0x1bf   :  { %v3544_v52 = vpop.f32.mrf.mxu3  ;;  %v3629_v47 = vmul.f32 %v3425_v22, %v3425_v22  ;;  %vm1051_vm13 = vcmp.ge.f32.partialorder %v3288_v42, 1.0  ;;  %vm1309_vm14 = vcmp.le.f32.partialorder %v3178_v31, 10.0  ;;  %v1764_v42 = vrot.slane %v3523_v34, 3 }
 0x1c0   :  { %v3546_v12 = vpop.f32.mrf.mxu2  ;;  %4065 = vst [vmem:[#allocation17_spill] sm:$0xff] %v3613_v38  ;;  %v4075_v34 = vrot.slane %v3498_v13, 1 }
 0x1c1   :  { %4057 = vst [vmem:[#allocation12_spill] sm:$0xff] %v3546_v12  ;;  %v1270_v12 = vrot.slane %v3471_v41, 1  ;;  %v1376_v41 = vadd.f32 %v1358_v16, %v3467_v21  ;;  %v1516_v21 = vrot.slane %v3490_v9, 2  ;;  %v1851_v16 = vsel %vm1797_vm1, %v1779_v35, 0.0 }
 0x1c2   :  { %v3550_v50 = vpop.f32.mrf.mxu1  ;;  %vm1310_vm1 = vcmp.le.f32.partialorder %v3197_v18, 10.0 }
 0x1c3   :  { %4058 = vst [vmem:[#allocation13_spill] sm:$0xff] %v3550_v50  ;;  %v1286_v29 = vsel %vm1278_vm9, %v1269_v0, %v1270_v12  ;;  %v1622_v0 = vadd.f32 %v1604_v4, %v1376_v41  ;;  %v1532_v41 = vsel %vm1524_vm3, %v1515_v14, %v1516_v21  ;;  %v1285_v4 = vsel %vm1278_vm9, %v1270_v12, %v1271_v45 }
 0x1c4   :  { %v1360_v51 = vsel %vm1306_vm2, %v1286_v29, 0.0  ;;  %v3652_v12 = vpop.f32.mrf.mxu0  ;;  %vm1800_vm2 = vcmp.le.f32.partialorder %v3161_v2, 8.0 }
 0x1c5   :  { %v1378_v29 = vadd.f32 %v1360_v51, %v3493_v27  ;;  %v1361_v27 = vsel %vm1307_vm4, %v1285_v4, 0.0  ;;  %vm1314_vm4 = vcmp.le.f32.partialorder %v3297_v53, 10.0 }
 0x1c6   :  { %v1379_v19 = vadd.f32 %v1361_v27, %v3505_v56 }
 0x1c7   :  { %v3565_v36 = vpop.f32.mrf.mxu3 }
 0x1c8   :  { %4060 = vst [vmem:[#allocation14_spill] sm:$0xff] %v3565_v36  ;;  %v3569_v50 = vpop.f32.mrf.mxu2  ;;  %v3580_v36 = vsel %vm1297_vm10, %v3295_v49, 0.0  ;;  %vm1553_vm10 = vcmp.le.f32.partialorder %v3139_v46, 9.0 }
 0x1c9   :  { %4061 = vst [vmem:[#allocation15_spill] sm:$0xff] %v3569_v50  ;;  %v1377_v50 = vadd.f32 %v1359_v58, %v3481_v43  ;;  %v1850_v43 = vsel %vm1796_vm15, %v1780_v54, 0.0  ;;  %v4043_v58 = vrot.slane %v3498_v13, 1  ;;  %vm1068_vm15 = vcmp.ge.f32.partialorder %v3297_v53, 1.0 }
 0x1ca   :  { %v3597_v49 = vpop.f32.mrf.mxu1  ;;  %v3631_v54 = vadd.f32 %v1850_v43, %v1622_v0  ;;  %v1763_v0 = vrot.slane %v3508_v30, 3  ;;  %v1273_v30 = vrot.slane %v3514_v3, 1 }
 0x1cb   :  { %4064 = vst [vmem:[#allocation16_spill] sm:$0xff] %v3597_v49  ;;  %v1623_v55 = vadd.f32 %v1605_v26, %v1377_v50  ;;  %v1762_v49 = vrot.slane %v3496_v63, 3  ;;  %v1517_v63 = vrot.slane %v3502_v61, 2  ;;  %v3644_v50 = vmul.f32 %v3447_v40, %v3447_v40 }
 0x1cc   :  { %v1284_v14 = vsel %vm1278_vm9, %v1271_v45, %v4043_v58  ;;  %v1606_v26 = vsel %vm1552_vm6, %v1532_v41, 0.0  ;;  %v3660_v61 = vmul.f32 %v3469_v33, %v3469_v33  ;;  %v3664_v45 = vmul.f32 %v3631_v54, %v3631_v54 }
 0x1cd   :  { %v3638_v35 = vadd.f32 %v1851_v16, %v1623_v55  ;;  %v1778_v43 = vsel %vm1770_vm0, %v1761_v62, %v1762_v49  ;;  %v1362_v51 = vsel %vm1308_vm7, %v1284_v14, 0.0  ;;  %v1531_v55 = vsel %vm1524_vm3, %v1516_v21, %v1517_v63 }
 0x1ce   :  { %4068 = vst [vmem:[#allocation20_spill] sm:$0xff] %v3664_v45  ;;  %v4046_v41 = vrot.slane %v3652_v12, 1  ;;  %v1624_v58 = vadd.f32 %v1606_v26, %v1378_v29  ;;  %v1852_v4 = vsel %vm1798_vm8, %v1778_v43, 0.0  ;;  %v1607_v3 = vsel %vm1553_vm10, %v1531_v55, 0.0 }
 0x1cf   :  { %v3621_v9 = vpop.f32.mrf.mxu3  ;;  %4067 = vst [vmem:[#allocation19_spill] sm:$0xff] %v3638_v35  ;;  %v3673_v62 = vmul.f32 %v3638_v35, %v3638_v35  ;;  %v1777_v26 = vsel %vm1770_vm0, %v1762_v49, %v1763_v0  ;;  %v4070_v43 = vrot.slane %v3265_v39, 1  ;;  %v4071_v49 = vrot.slane %v3329_v10, 7 }
 0x1d0   :  { %v3625_v38 = vpop.f32.mrf.mxu2  ;;  %v1030_v14 = vrot.slane %v3621_v9, 7  ;;  %v1518_v39 = vrot.slane %v3512_v37, 2  ;;  %vm1560_vm6 = vcmp.le.f32.partialorder %v3297_v53, 9.0  ;;  %v1853_v37 = vsel %vm1799_vm11, %v1777_v26, 0.0  ;;  %v4089_v9 = vld [vmem:[#allocation15_spill] sm:$0xff] }
 0x1d1   :  { %4066 = vst [vmem:[#allocation18_spill] sm:$0xff] %v3625_v38  ;;  %vm1311_vm7 = vcmp.le.f32.partialorder %v3223_v6, 10.0  ;;  %vm1555_vm8 = vcmp.le.f32.partialorder %v3178_v31, 9.0  ;;  %vm1806_vm10 = vcmp.le.f32.partialorder %v3297_v53, 8.0  ;;  %vm1064_vm11 = vcmp.ge.f32.partialorder %v3197_v18, 1.0 }
 0x1d2   :  { %v3669_v16 = vpop.f32.mrf.mxu1  ;;  %4069 = vst [vmem:[#allocation21_spill] sm:$0xff] %v3673_v62  ;;  %v1274_v62 = vrot.slane %v3534_v32, 1  ;;  %v1625_v32 = vadd.f32 %v1607_v3, %v1379_v19  ;;  %v1380_v13 = vadd.f32 %v1362_v51, %v3517_v48  ;;  %v1776_v26 = vsel %vm1770_vm0, %v1763_v0, %v1764_v42  ;;  %v4076_v51 = vld [vmem:[#allocation3_spill] sm:$0xff] }
 0x1d3   :  { %v4073_v38 = vrot.slane %v3669_v16, 2  ;;  %v1027_v0 = vrot.slane %v3536_v20, 7 }
 0x1d4   :  { %v3753_v19 = vadd.f32 %v1853_v37, %v1625_v32  ;;  %v1282_v3 = vsel %vm1278_vm9, %v1273_v30, %v1274_v62  ;;  %v4077_v32 = vld [vmem:[#allocation10_spill] sm:$0xff] }
 0x1d5   :  { %v1765_v37 = vrot.slane %v4077_v32, 3  ;;  %v4086_v32 = vld [vmem:[#allocation13_spill] sm:$0xff] }
 0x1d7   :  { %v1011_v45 = vpop.f32.mrf.mxu3 }
 0x1d8   :  { %v1031_v21 = vrot.slane %v1011_v45, 7  ;;  %v3689_v29 = vpop.f32.mrf.mxu2  ;;  %v1296_v45 = vsel %vm1278_vm9, %v4046_v41, %v4070_v43  ;;  %v4072_v41 = vrot.slane %v3311_v24, 2 }
 0x1d9   :  { %v1769_v55 = vrot.slane %v3689_v29, 3  ;;  %v1368_v24 = vsel %vm1314_vm4, %v1296_v45, 0.0  ;;  %vm1312_vm4 = vcmp.le.f32.partialorder %v4076_v51, 10.0 }
 0x1da   :  { %v1033_v56 = vsel %vm1032_vm5, %v1030_v14, %v1031_v21  ;;  %v1050_v27 = vsel %vm1032_vm5, %v1031_v21, %v4071_v49  ;;  %v1542_v10 = vsel %vm1524_vm3, %v4073_v38, %v4072_v41 }
 0x1db   :  { %v1105_v35 = vsel %vm1051_vm13, %v1050_v27, 0.0  ;;  %v1122_v43 = vsel %vm1068_vm15, %v1033_v56, 0.0  ;;  %vm1065_vm13 = vcmp.ge.f32.partialorder %v3223_v6, 1.0  ;;  %v1519_v56 = vrot.slane %v3529_v28, 2 }
 0x1dc   :  { %v1123_v21 = vadd.f32 %v1105_v35, %v3325_v17  ;;  %v1140_v49 = vadd.f32 %v1122_v43, %v3327_v5  ;;  %v4074_v17 = vrot.slane %v3331_v25, 3  ;;  %v3742_v5 = vadd.f32 %v1852_v4, %v1624_v58 }
 0x1dd   :  { %v1283_v35 = vsel %vm1278_vm9, %v4075_v34, %v1273_v30  ;;  %v1614_v25 = vsel %vm1560_vm6, %v1542_v10, 0.0  ;;  %vm1801_vm15 = vcmp.le.f32.partialorder %v3178_v31, 8.0  ;;  %v1364_v28 = vsel %vm1310_vm1, %v1282_v3, 0.0  ;;  %v4080_v34 = vld [vmem:[#allocation14_spill] sm:$0xff] }
 0x1de   :  { %v1369_v38 = vadd.f32 %v3580_v36, %v1123_v21  ;;  %v1386_v41 = vadd.f32 %v1368_v24, %v1140_v49  ;;  %v1788_v46 = vsel %vm1770_vm0, %v1769_v55, %v4074_v17  ;;  %v1530_v36 = vsel %vm1524_vm3, %v1517_v63, %v1518_v39  ;;  %v4078_v17 = vld [vmem:[#allocation8_spill] sm:$0xff] }
 0x1df   :  { %v1275_v63 = vrot.slane %v3542_v57, 1  ;;  %v1860_v45 = vsel %vm1806_vm10, %v1788_v46, 0.0  ;;  %v1608_v53 = vsel %vm1554_vm12, %v1530_v36, 0.0  ;;  %v3774_v48 = vmul.f32 %v3742_v5, %v3742_v5  ;;  %v4081_v36 = vld [vmem:[#allocation5_spill] sm:$0xff] }
 0x1e0   :  { %v1615_v58 = vadd.f32 %v3583_v11, %v1369_v38  ;;  %v1632_v4 = vadd.f32 %v1614_v25, %v1386_v41  ;;  %v1363_v57 = vsel %vm1309_vm14, %v1283_v35, 0.0  ;;  %vm1066_vm12 = vcmp.ge.f32.partialorder %v4076_v51, 1.0  ;;  %v4082_v25 = vld [vmem:[#allocation17_spill] sm:$0xff] }
 0x1e1   :  { %v3791_v10 = vmul.f32 %v3753_v19, %v3753_v19  ;;  %v1626_v20 = vadd.f32 %v1608_v53, %v1380_v13  ;;  %v1281_v21 = vsel %vm1278_vm9, %v1274_v62, %v1275_v63  ;;  %v1028_v49 = vrot.slane %v3544_v52, 7  ;;  %v4084_v13 = vld [vmem:[#allocation11_spill] sm:$0xff] }
 0x1e2   :  { %v3768_v11 = vadd.f32 %v3589_v60, %v1615_v58  ;;  %v3770_v30 = vadd.f32 %v1860_v45, %v1632_v4  ;;  %v1854_v60 = vsel %vm1800_vm2, %v1776_v26, 0.0  ;;  %v1529_v2 = vsel %vm1524_vm3, %v1518_v39, %v1519_v56  ;;  %v4083_v58 = vld [vmem:[#allocation9_spill] sm:$0xff] }
 0x1e3   :  { %vm1556_vm14 = vcmp.le.f32.partialorder %v3197_v18, 9.0  ;;  %v3802_v41 = vadd.f32 %v1854_v60, %v1626_v20  ;;  %v4079_v46 = vrot.slane %v4078_v17, 7  ;;  %v1276_v52 = vrot.slane %v3577_v1, 1 }
 0x1e4   :  { %v1879_v27 = vadd.f32 %v3376_v44, %v3768_v11  ;;  %v1902_v43 = vmul.f32 %v3768_v11, %v3768_v11  ;;  %v1029_v35 = vrot.slane %v4080_v34, 7  ;;  %v1365_v39 = vsel %vm1311_vm7, %v1281_v21, 0.0 }
 0x1e5   :  { %v1037_v62 = vsel %vm1032_vm5, %v4079_v46, %v1027_v0  ;;  %vm1802_vm1 = vcmp.le.f32.partialorder %v3197_v18, 8.0  ;;  %vm1557_vm2 = vcmp.le.f32.partialorder %v3223_v6, 9.0  ;;  %vm1067_vm6 = vcmp.ge.f32.partialorder %v4081_v36, 1.0 }
 0x1e6   :  { %v1880_v24 = vadd.f32 %v1879_v27, %v3394_v7  ;;  %v1920_v38 = vadd.f32 %v3609_v59, %v1902_v43  ;;  %v1381_v4 = vadd.f32 %v1363_v57, %v4083_v58  ;;  %v1609_v1 = vsel %vm1555_vm8, %v1529_v2, 0.0 }
 0x1e7   :  { %v1520_v26 = vrot.slane %v4084_v13, 2  ;;  %v1036_v45 = vsel %vm1032_vm5, %v1027_v0, %v1028_v49  ;;  %v1118_v53 = vsel %vm1064_vm11, %v1037_v62, 0.0  ;;  %v1775_v60 = vsel %vm1770_vm0, %v1764_v42, %v1765_v37  ;;  %v4085_v0 = vld [vmem:[#allocation12_spill] sm:$0xff] }
 0x1e8   :  { %v1881_v59 = vadd.f32 %v1880_v24, %v3409_v23  ;;  %v1921_v3 = vadd.f32 %v1920_v38, %v4082_v25  ;;  %vm1313_vm7 = vcmp.le.f32.partialorder %v4081_v36, 10.0  ;;  %v3832_v43 = vmul.f32 %v3802_v41, %v3802_v41 }
 0x1e9   :  { %v1280_v20 = vsel %vm1278_vm9, %v1275_v63, %v1276_v52  ;;  %v1766_v21 = vrot.slane %v4085_v0, 3  ;;  %v1035_v2 = vsel %vm1032_vm5, %v1028_v49, %v1029_v35  ;;  %v1119_v42 = vsel %vm1065_vm13, %v1036_v45, 0.0  ;;  %v4087_v63 = vld [vmem:[#allocation2_spill] sm:$0xff]  ;;  %v4094_v0 = vld [vmem:[#allocation19_spill] sm:$0xff] }
 0x1ea   :  { %v1882_v27 = vadd.f32 %v1881_v59, %v3425_v22  ;;  %v1922_v57 = vadd.f32 %v1921_v3, %v3618_v15  ;;  %v1521_v24 = vrot.slane %v4086_v32, 2  ;;  %vm1803_vm8 = vcmp.le.f32.partialorder %v3223_v6, 8.0 }
 0x1eb   :  { %vm1558_vm10 = vcmp.le.f32.partialorder %v4076_v51, 9.0  ;;  %v1627_v17 = vadd.f32 %v1609_v1, %v1381_v4  ;;  %v1136_v46 = vadd.f32 %v1118_v53, %v4087_v63  ;;  %v1855_v62 = vsel %vm1801_vm15, %v1775_v60, 0.0  ;;  %v4091_v60 = vld [vmem:[#allocation6_spill] sm:$0xff] }
 0x1ec   :  { %v1883_v15 = vadd.f32 %v1882_v27, %v3447_v40  ;;  %v1923_v38 = vadd.f32 %v1922_v57, %v3629_v47  ;;  %v1528_v49 = vsel %vm1524_vm3, %v1519_v56, %v1520_v26  ;;  %v1120_v34 = vsel %vm1066_vm12, %v1035_v2, 0.0  ;;  %v4088_v56 = vld [vmem:[#allocation4_spill] sm:$0xff] }
 0x1ed   :  { %v1034_v59 = vsel %vm1032_vm5, %v1029_v35, %v1030_v14  ;;  %vm1804_vm11 = vcmp.le.f32.partialorder %v4076_v51, 8.0  ;;  %vm1559_vm13 = vcmp.le.f32.partialorder %v4081_v36, 9.0  ;;  %v1366_v25 = vsel %vm1312_vm4, %v1280_v20, 0.0  ;;  %v4090_v35 = vld [vmem:[#allocation16_spill] sm:$0xff]  ;;  %v4093_v20 = vld [vmem:[#allocation18_spill] sm:$0xff] }
 0x1ee   :  { %v1884_v47 = vadd.f32 %v1883_v15, %v3469_v33  ;;  %v1924_v31 = vadd.f32 %v1923_v38, %v3644_v50  ;;  %v1137_v3 = vadd.f32 %v1119_v42, %v4088_v56  ;;  %v1774_v58 = vsel %vm1770_vm0, %v1765_v37, %v1766_v21  ;;  %v4095_v42 = vld [vmem:[#allocation20_spill] sm:$0xff] }
 0x1ef   :  { %v1767_v4 = vrot.slane %v4089_v9, 3  ;;  %v1527_v14 = vsel %vm1524_vm3, %v1520_v26, %v1521_v24  ;;  %v1522_v1 = vrot.slane %v4090_v35, 2  ;;  %vm1805_vm5 = vcmp.le.f32.partialorder %v4081_v36, 8.0 }
 0x1f0   :  { %v1925_v13 = vadd.f32 %v1924_v31, %v3660_v61  ;;  %v1885_v50 = vadd.f32 %v1884_v47, %v3631_v54  ;;  %v1382_v45 = vadd.f32 %v1364_v28, %v1136_v46  ;;  %v1610_v53 = vsel %vm1556_vm14, %v1528_v49, 0.0 }
 0x1f1   :  { %v1138_v27 = vadd.f32 %v1120_v34, %v4091_v60  ;;  %v1121_v37 = vsel %vm1067_vm6, %v1034_v59, 0.0  ;;  %v4092_v57 = vrot.slane %v3652_v12, 1  ;;  %v1768_v61 = vrot.slane %v4093_v20, 3  ;;  %v4097_v34 = vld [vmem:[#allocation21_spill] sm:$0xff] }
 0x1f2   :  { %v1886_v2 = vadd.f32 %v1885_v50, %v4094_v0  ;;  %v1926_v32 = vadd.f32 %v1925_v13, %v4095_v42  ;;  %v1856_v28 = vsel %vm1802_vm1, %v1774_v58, 0.0  ;;  %v1383_v15 = vadd.f32 %v1365_v39, %v1137_v3 }
 0x1f3   :  { %v1279_v26 = vsel %vm1278_vm9, %v1276_v52, %v4092_v57  ;;  %v1611_v38 = vsel %vm1557_vm2, %v1527_v14, 0.0  ;;  %v1773_v63 = vsel %vm1770_vm0, %v1766_v21, %v1767_v4  ;;  %v1526_v12 = vsel %vm1524_vm3, %v1521_v24, %v1522_v1  ;;  %v4096_v52 = vld [vmem:[#allocation7_spill] sm:$0xff] }
 0x1f4   :  { %v1139_v46 = vadd.f32 %v1121_v37, %v4096_v52  ;;  %v1887_v49 = vadd.f32 %v1886_v2, %v3742_v5  ;;  %v1927_v59 = vadd.f32 %v1926_v32, %v4097_v34  ;;  %v3896_v47 = vadd.f32 %v1855_v62, %v1627_v17 }
 0x1f5   :  { %v1628_v18 = vadd.f32 %v1610_v53, %v1382_v45  ;;  %v1367_v39 = vsel %vm1313_vm7, %v1279_v26, 0.0  ;;  %v1384_v31 = vadd.f32 %v1366_v25, %v1138_v27  ;;  %v1772_v56 = vsel %vm1770_vm0, %v1767_v4, %v1768_v61 }
 0x1f6   :  { %v4098_v21 = vrot.slane %v3669_v16, 2  ;;  %v1888_v3 = vadd.f32 %v1887_v49, %v3753_v19  ;;  %v1928_v58 = vadd.f32 %v1927_v59, %v3774_v48  ;;  %v1629_v17 = vadd.f32 %v1611_v38, %v1383_v15 }
 0x1f7   :  { %v3908_v9 = vadd.f32 %v1856_v28, %v1628_v18  ;;  %v1857_v62 = vsel %vm1803_vm8, %v1773_v63, 0.0  ;;  %v1612_v25 = vsel %vm1558_vm10, %v1526_v12, 0.0  ;;  %v1385_v14 = vadd.f32 %v1367_v39, %v1139_v46 }
 0x1f8   :  { %v1525_v24 = vsel %vm1524_vm3, %v1522_v1, %v4098_v21  ;;  %v1771_v16 = vsel %vm1770_vm0, %v1768_v61, %v1769_v55  ;;  %v1889_v4 = vadd.f32 %v1888_v3, %v3802_v41  ;;  %v1929_v35 = vadd.f32 %v1928_v58, %v3791_v10 }
 0x1f9   :  { %v1914_v48 = vmul.f32 %v3896_v47, %v3896_v47  ;;  %v1858_v6 = vsel %vm1804_vm11, %v1772_v56, 0.0  ;;  %v1613_v1 = vsel %vm1559_vm13, %v1525_v24, 0.0  ;;  %v3926_v13 = vadd.f32 %v1857_v62, %v1629_v17 }
 0x1fa   :  { %v1630_v50 = vadd.f32 %v1612_v25, %v1384_v31  ;;  %v1890_v29 = vadd.f32 %v1889_v4, %v3896_v47  ;;  %v1930_v8 = vadd.f32 %v1929_v35, %v3832_v43  ;;  %v1915_v55 = vmul.f32 %v3908_v9, %v3908_v9 }
 0x1fb   :  { %v1859_v10 = vsel %vm1805_vm5, %v1771_v16, 0.0  ;;  %v1631_v51 = vadd.f32 %v1613_v1, %v1385_v14  ;;  %v1916_v27 = vmul.f32 %v3926_v13, %v3926_v13  ;;  %v1919_v28 = vmul.f32 %v3770_v30, %v3770_v30 }
 0x1fc   :  { %v3934_v45 = vadd.f32 %v1858_v6, %v1630_v50  ;;  %v1891_v53 = vadd.f32 %v1890_v29, %v3908_v9  ;;  %v1931_v60 = vadd.f32 %v1930_v8, %v1914_v48  ;;  %v1947_v48 = vld [vmem:[%s4027_s3] sm:$0x1] }
 0x1fd   :  { %v1877_v37 = vadd.f32 %v1859_v10, %v1631_v51  ;;  %v1960_v29 = vld [vmem:[%s4028_s4] sm:$0x1] }
 0x1fe   :  { %v1892_v57 = vadd.f32 %v1891_v53, %v3926_v13  ;;  %v1932_v26 = vadd.f32 %v1931_v60, %v1915_v55  ;;  %v1917_v43 = vmul.f32 %v3934_v45, %v3934_v45 }
 0x1ff   :  { %v1918_v2 = vmul.f32 %v1877_v37, %v1877_v37 }
 0x200   :  { %v1893_v20 = vadd.f32 %v1892_v57, %v3934_v45  ;;  %v1933_v36 = vadd.f32 %v1932_v26, %v1916_v27 }
 0x202   :  { %v1894_v61 = vadd.f32 %v1893_v20, %v1877_v37  ;;  %v1934_v42 = vadd.f32 %v1933_v36, %v1917_v43 }
 0x204   :  { %v1895_v32 = vadd.f32 %v1894_v61, %v3770_v30  ;;  %v1935_v15 = vadd.f32 %v1934_v42, %v1918_v2 }
 0x206   :  { %v1896_v38 = vrot.slane %v1895_v32, 4  ;;  %v1936_v63 = vadd.f32 %v1935_v15, %v1919_v28 }
 0x208   :  { %v1897_v12 = vadd.f32 %v1896_v38, %v1895_v32  ;;  %v1937_v52 = vrot.slane %v1936_v63, 4 }
 0x20a   :  { %v1898_v46 = vrot.slane %v1897_v12, 2  ;;  %v1938_v49 = vadd.f32 %v1937_v52, %v1936_v63 }
 0x20c   :  { %v1899_v34 = vadd.f32 %v1898_v46, %v1897_v12  ;;  %v1939_v59 = vrot.slane %v1938_v49, 2 }
 0x20e   :  { %v1900_v18 = vrot.slane %v1899_v34, 1  ;;  %v1940_v39 = vadd.f32 %v1939_v59, %v1938_v49 }
 0x210   :  { %v1901_v31 = vadd.f32 %v1900_v18, %v1899_v34  ;;  %v1941_v56 = vrot.slane %v1940_v39, 1 }
 0x212   :  { %v1942_v21 = vadd.f32 %v1941_v56, %v1940_v39  ;;  %v1943_v24 = vmul.f32 0.0069444445, %v1901_v31 }
 0x214   :  { %v1944_v3 = vmul.f32 0.0069444445, %v1942_v21  ;;  %v1945_v58 = vmul.f32 %v1943_v24, %v1943_v24 }
 0x216   :  { %v1946_v17 = vsub.f32 %v1944_v3, %v1945_v58 }
 0x218   :  { %v1948_v62 = vadd.f32 0.001, %v1946_v17 }
 0x21a   :  { %2447 = vrsqrt.f32 %v1948_v62  ;;  %vm1955_vm3 = vweird.f32 %v1948_v62 }
 0x220   :  { %v2448_v25 = vpop.eup %2447 }
 0x221   :  { %v1950_v14 = vmul.f32 %v2448_v25, %v1948_v62  ;;  %vm1956_vm9 = vweird.f32 %v2448_v25 }
 0x222   :  { %vm1957_vm0 = vmor %vm1955_vm3, %vm1956_vm9 }
 0x223   :  { %v1951_v16 = vmul.f32 %v2448_v25, %v1950_v14 }
 0x225   :  { %v1952_v4 = vmul.f32 0.5, %v1951_v16 }
 0x227   :  { %v1953_v35 = vsub.f32 1.5, %v1952_v4 }
 0x229   :  { %v1954_v6 = vmul.f32 %v2448_v25, %v1953_v35 }
 0x22b   :  { %v1958_v1 = vsel %vm1957_vm0, %v2448_v25, %v1954_v6 }
 0x22c   :  { %v1959_v50 = vmul.f32 %v1958_v1, %v1947_v48 }
 0x22e   :  { %v1961_v8 = vmul.f32 %v1959_v50, %v1943_v24  ;;  %v1964_v55 = vperm.slane %v1959_v50, 0 }
 0x230   :  { %v1962_v10 = vsub.f32 %v1960_v29, %v1961_v8  ;;  %v1966_v51 = vmul.f32 %v1964_v55, %v3768_v11  ;;  %v1967_v53 = vmul.f32 %v1964_v55, %v3376_v44  ;;  %v1968_v60 = vmul.f32 %v1964_v55, %v3394_v7 }
 0x231   :  { %v1969_v27 = vmul.f32 %v1964_v55, %v3409_v23  ;;  %v1970_v57 = vmul.f32 %v1964_v55, %v3425_v22  ;;  %v1971_v26 = vmul.f32 %v1964_v55, %v3447_v40  ;;  %v1972_v43 = vmul.f32 %v1964_v55, %v3469_v33 }
 0x232   :  { %v1973_v20 = vmul.f32 %v1964_v55, %v3631_v54  ;;  %v1974_v36 = vmul.f32 %v1964_v55, %v4094_v0  ;;  %v1975_v61 = vmul.f32 %v1964_v55, %v3742_v5  ;;  %v1976_v11 = vmul.f32 %v1964_v55, %v3753_v19 }
 0x233   :  { %v1977_v44 = vmul.f32 %v1964_v55, %v3802_v41  ;;  %v1982_v2 = vmul.f32 %v1964_v55, %v1877_v37  ;;  %v1983_v7 = vmul.f32 %v1964_v55, %v3770_v30  ;;  %v1985_v23 = vperm.slane %v1962_v10, 0 }
 0x234   :  { %v1978_v22 = vmul.f32 %v1964_v55, %v3896_v47  ;;  %v1979_v40 = vmul.f32 %v1964_v55, %v3908_v9  ;;  %v1980_v33 = vmul.f32 %v1964_v55, %v3926_v13  ;;  %v1981_v54 = vmul.f32 %v1964_v55, %v3934_v45 }
 0x235   :  { %v1987_v42 = vadd.f32 %v1985_v23, %v1966_v51  ;;  %v1988_v0 = vadd.f32 %v1985_v23, %v1967_v53  ;;  %v1989_v32 = vadd.f32 %v1985_v23, %v1968_v60  ;;  %v1990_v5 = vadd.f32 %v1985_v23, %v1969_v27 }
 0x236   :  { %v1991_v28 = vadd.f32 %v1985_v23, %v1970_v57  ;;  %v1992_v19 = vadd.f32 %v1985_v23, %v1971_v26  ;;  %v1993_v15 = vadd.f32 %v1985_v23, %v1972_v43  ;;  %v1994_v41 = vadd.f32 %v1985_v23, %v1973_v20 }
 0x237   :  { %v1995_v37 = vadd.f32 %v1985_v23, %v1974_v36  ;;  %v1996_v38 = vadd.f32 %v1985_v23, %v1975_v61  ;;  %v1997_v30 = vadd.f32 %v1985_v23, %v1976_v11  ;;  %v1998_v63 = vadd.f32 %v1985_v23, %v1977_v44 }
 0x238   :  { %v1999_v12 = vadd.f32 %v1985_v23, %v1978_v22  ;;  %v2000_v47 = vadd.f32 %v1985_v23, %v1979_v40  ;;  %v2001_v52 = vadd.f32 %v1985_v23, %v1980_v33  ;;  %v2002_v9 = vadd.f32 %v1985_v23, %v1981_v54 }
 0x239   :  { %v2003_v46 = vadd.f32 %v1985_v23, %v1982_v2  ;;  %v2004_v13 = vadd.f32 %v1985_v23, %v1983_v7  ;;  %v2005_v49 = vmax.f32 %v1987_v42, 0.0  ;;  %v2006_v45 = vmax.f32 %v1988_v0, 0.0 }
 0x23a   :  { %v2007_v34 = vmax.f32 %v1989_v32, 0.0  ;;  %v2008_v59 = vmax.f32 %v1990_v5, 0.0  ;;  %v2009_v18 = vmax.f32 %v1991_v28, 0.0  ;;  %v2010_v39 = vmax.f32 %v1992_v19, 0.0 }
 0x23b   :  { %2023 = vst [vmem:[%s4029_s6] sm:$0xff] %v2005_v49  ;;  %v2011_v31 = vmax.f32 %v1993_v15, 0.0  ;;  %v2012_v56 = vmax.f32 %v1994_v41, 0.0  ;;  %v2013_v21 = vmax.f32 %v1995_v37, 0.0  ;;  %v2014_v24 = vmax.f32 %v1996_v38, 0.0 }
 0x23c   :  { %2024 = vst [vmem:[%s4029_s6 + $0x8] sm:$0xff] %v2006_v45  ;;  %v2015_v3 = vmax.f32 %v1997_v30, 0.0  ;;  %v2016_v58 = vmax.f32 %v1998_v63, 0.0  ;;  %v2017_v17 = vmax.f32 %v1999_v12, 0.0  ;;  %v2018_v62 = vmax.f32 %v2000_v47, 0.0 }
 0x23d   :  { %2025 = vst [vmem:[%s4029_s6 + $0x10] sm:$0xff] %v2007_v34  ;;  %v2019_v25 = vmax.f32 %v2001_v52, 0.0  ;;  %v2020_v14 = vmax.f32 %v2002_v9, 0.0  ;;  %v2021_v16 = vmax.f32 %v2003_v46, 0.0  ;;  %v2022_v4 = vmax.f32 %v2004_v13, 0.0 }
 0x23e   :  { %2026 = vst [vmem:[%s4029_s6 + $0x18] sm:$0xff] %v2008_v59 }
 0x23f   :  { %2027 = vst [vmem:[%s4029_s6 + $0x20] sm:$0xff] %v2009_v18 }
 0x240   :  { %2028 = vst [vmem:[%s4029_s6 + $0x28] sm:$0xff] %v2010_v39 }
 0x241   :  { %2029 = vst [vmem:[%s4029_s6 + $0x30] sm:$0xff] %v2011_v31 }
 0x242   :  { %2030 = vst [vmem:[%s4029_s6 + $0x38] sm:$0xff] %v2012_v56 }
 0x243   :  { %2031 = vst [vmem:[%s4029_s6 + $0x40] sm:$0xff] %v2013_v21 }
 0x244   :  { %2032 = vst [vmem:[%s4029_s6 + $0x48] sm:$0xff] %v2014_v24 }
 0x245   :  { %2033 = vst [vmem:[%s4029_s6 + $0x50] sm:$0xff] %v2015_v3 }
 0x246   :  { %2034 = vst [vmem:[%s4029_s6 + $0x58] sm:$0xff] %v2016_v58 }
 0x247   :  { %2035 = vst [vmem:[%s4029_s6 + $0x60] sm:$0xff] %v2017_v17 }
 0x248   :  { %2036 = vst [vmem:[%s4029_s6 + $0x68] sm:$0xff] %v2018_v62 }
 0x249   :  { %2037 = vst [vmem:[%s4029_s6 + $0x70] sm:$0xff] %v2019_v25 }
 0x24a   :  { %2038 = vst [vmem:[%s4029_s6 + $0x78] sm:$0xff] %v2020_v14 }
 0x24b   :  { %2039 = vst [vmem:[%s4029_s6 + $0x80] sm:$0xff] %v2021_v16 }
 0x24c   :  { %2040 = vst [vmem:[%s4029_s6 + $0x88] sm:$0xff] %v2022_v4 }

</bundles_post_ra>
